<compile_context>
chip_gen: v7x
topology: tpu7x:2x2x1
jax: 0.10.0
libtpu: 0.0.40
codegen_flags: <defaults>
</compile_context>

<pallas_src>
import functools
import math

import jax
import jax.numpy as jnp
from jax.experimental import pallas as pl
from jax.experimental.pallas import tpu as pltpu


def _layer_norm(x, g, b, eps):
    mu = jnp.mean(x, axis=-1, keepdims=True)
    var = jnp.mean(jnp.square(x - mu), axis=-1, keepdims=True)
    return (x - mu) * jax.lax.rsqrt(var + eps) * g + b


def _forward_body(q_ref, k_ref, v_ref,
                  wq_ref, bq_ref, wk_ref, bk_ref, wv_ref, bv_ref,
                  wo_ref, bo_ref, ln1g_ref, ln1b_ref,
                  w1_ref, b1_ref, w2_ref, b2_ref, ln2g_ref, ln2b_ref,
                  out_ref, q_scr, k_scr, v_scr, attn_scr, *,
                  n_heads, d_k, mask_k, zero_pad, apply_pos, kq_same,
                  compute_dtype, approx_recip, eps=1e-5):
    bt, S, D = q_ref.shape
    n_rows = bt * S
    f32 = jnp.float32

    xq = q_ref[...].reshape(n_rows, D)
    xq_f32 = xq.astype(f32)                          # residual (stays f32)
    xq_c = xq.astype(compute_dtype)
    xk_c = k_ref[...].reshape(n_rows, D).astype(compute_dtype)
    xv_c = v_ref[...].reshape(n_rows, D).astype(compute_dtype)

    # ---- fused projections (full K=D, large M for the MXU) ----------------
    if kq_same:
        # Shared Wk: stack q & k rows -> ONE (2*Bt*S, D) x (D, D) matmul.
        xqk = jnp.concatenate([xq_c, xk_c], axis=0)
        qk = jnp.dot(xqk, wk_ref[...], preferred_element_type=f32) + bk_ref[...]
        qp = qk[:n_rows]
        kp = qk[n_rows:]
    else:
        qp = jnp.dot(xq_c, wq_ref[...], preferred_element_type=f32) + bq_ref[...]
        kp = jnp.dot(xk_c, wk_ref[...], preferred_element_type=f32) + bk_ref[...]
    vp = jnp.dot(xv_c, wv_ref[...], preferred_element_type=f32) + bv_ref[...]

    # Fold 1/sqrt(d_k) into q once (Bt*S*D muls) instead of scaling every
    # (Bt, S, S) score block per head.
    qp = qp * (1.0 / math.sqrt(d_k))

    # Single cast to the MXU dtype, staged through VMEM scratch so per-head
    # slices are cheap ref reads instead of value relayouts; no f32 copies of
    # qp/kp/vp stay live past this point.
    q_scr[...] = qp.reshape(bt, S, D).astype(compute_dtype)
    k_scr[...] = kp.reshape(bt, S, D).astype(compute_dtype)
    v_scr[...] = vp.reshape(bt, S, D).astype(compute_dtype)

    # src_mask = (triu(ones, k=mask_k) == 0) -> attend where col < row+mask_k
    row = jax.lax.broadcasted_iota(jnp.int32, (S, S), 0)
    col = jax.lax.broadcasted_iota(jnp.int32, (S, S), 1)
    valid = (col < (row + mask_k))[None]             # (1, S, S)
    first_row = (row == 0)[None]                     # (1, S, S)

    # Per-head attention; head outputs land at their lane offset in attn_scr,
    # followed by ONE (Bt*S, D) x (D, D) Wo matmul (no per-head K=d_k dots).
    # TODO(synk): for large S, tile this flash-style (online softmax over kv
    #             chunks) so the (Bt, S, S) f32 score block never materialises.
    for h in range(n_heads):                         # n_heads is small & static
        lo = h * d_k
        qh = q_scr[:, :, lo:lo + d_k]                # (Bt, S, d_k)
        kh = k_scr[:, :, lo:lo + d_k]
        vh = v_scr[:, :, lo:lo + d_k]

        s = jnp.einsum("bqd,bkd->bqk", qh, kh, preferred_element_type=f32)
        s = jnp.where(valid, s, -1e32)               # f32 only: -1e32 overflows bf16
        s = s - jnp.max(s, axis=-1, keepdims=True)
        p = jnp.exp(s)                               # unnormalised probabilities
        l = jnp.sum(p, axis=-1, keepdims=True)
        if zero_pad:
            p = jnp.where(first_row, 0.0, p)         # zero first query row
        # TODO(synk): attention dropout omitted (eval-mode identity).

        oh = jnp.einsum("bqk,bkd->bqd", p.astype(compute_dtype), vh,
                        preferred_element_type=f32)  # (Bt, S, d_k)
        # Normalise AFTER the PV matmul: Bt*S*d_k muls instead of Bt*S*S.
        if approx_recip:
            oh = oh * pl.reciprocal(l, approx=True)  # EUP slot, otherwise idle
        else:
            oh = oh / l
        attn_scr[:, :, lo:lo + d_k] = oh.astype(compute_dtype)

    proj = jnp.dot(attn_scr[...].reshape(n_rows, D), wo_ref[...],
                   preferred_element_type=f32)
    x = xq_f32 + proj + bo_ref[...]                  # dropout1 == identity
    x = _layer_norm(x, ln1g_ref[...], ln1b_ref[...], eps)

    if apply_pos:
        # TODO(synk): on v7x, w1/w2 could be quantised to fp8 for the native
        #             fp8 MXU path (not portable to v5e/v6e).
        h1 = jnp.dot(x.astype(compute_dtype), w1_ref[...],
                     preferred_element_type=f32) + b1_ref[...]
        h1 = jnp.maximum(h1, 0.0)                    # ReLU; inner dropout == id
        ff = jnp.dot(h1.astype(compute_dtype), w2_ref[...],
                     preferred_element_type=f32) + b2_ref[...]
        x = x + ff                                   # dropout2 == identity
        x = _layer_norm(x, ln2g_ref[...], ln2b_ref[...], eps)

    out_ref[...] = x.reshape(bt, S, D).astype(out_ref.dtype)


def _make_kernel(kq_same, **static):
    body = functools.partial(_forward_body, kq_same=kq_same, **static)
    if not kq_same:
        return body   # expects separate wq/bq refs

    def kernel(q_ref, k_ref, v_ref, wk_ref, bk_ref, wv_ref, bv_ref,
               wo_ref, bo_ref, ln1g_ref, ln1b_ref, w1_ref, b1_ref,
               w2_ref, b2_ref, ln2g_ref, ln2b_ref,
               out_ref, q_scr, k_scr, v_scr, attn_scr):
        # Shared k/q weight: reuse the same refs for both projections.
        body(q_ref, k_ref, v_ref, wk_ref, bk_ref, wk_ref, bk_ref,
             wv_ref, bv_ref, wo_ref, bo_ref, ln1g_ref, ln1b_ref,
             w1_ref, b1_ref, w2_ref, b2_ref, ln2g_ref, ln2b_ref,
             out_ref, q_scr, k_scr, v_scr, attn_scr)

    return kernel


# --------------------------- tiling / VMEM policy ---------------------------

def _physical_vmem_bytes():
    """Physical VMEM per core; conservative (v7x) default if the query fails."""
    try:
        info = pltpu.get_tpu_info()
        v = getattr(info, "vmem_capacity_bytes", None)
        if v:
            return int(v)
    except Exception:
        pass
    return 64 * 1024 * 1024


def _step_vmem_bytes(bt, S, D, d_ff, weight_bytes, in_item, out_item, c_item,
                     apply_pos):
    """Rough per-grid-step VMEM footprint (weights single-buffered)."""
    rows = bt * S
    act = rows * D
    b = weight_bytes                        # resident weights (1 buffer)
    b += 2 * 3 * act * in_item              # double-buffered q/k/v input tiles
    b += 2 * act * out_item                 # double-buffered output tile
    b += 4 * act * c_item                   # q/k/v/attn VMEM scratch
    b += 2 * bt * S * S * 4                 # one head's f32 score + exp block
    b += 6 * act * 4                        # live f32 intermediates
    if apply_pos:
        b += rows * d_ff * (4 + c_item)     # FFN hidden (f32 + MXU-dtype copy)
    return int(b)


def _pick_batch_tile(batch, seq, fits, target_rows=256):
    """Smallest batch tile with bt*seq >= target_rows (keeps the MXU M
    dimension full and naturally leaves >=2 grid steps for v7x's two
    TensorCores when the batch allows); otherwise the largest divisor that
    fits VMEM — a grid of 1 is fine on single-TensorCore v5e/v6e."""
    divisors = [d for d in range(1, batch + 1) if batch % d == 0]
    fitting = [d for d in divisors if fits(d)]
    if not fitting:
        return 1
    for d in fitting:
        if d * seq >= target_rows:
            return d
    return fitting[-1]


# ------------------------------- entry point --------------------------------

def prepare_params(params, compute_dtype=jnp.bfloat16, kq_same=True):
    """Cast the matmul weights to the MXU compute dtype ONCE, outside the hot
    path.  Biases / LayerNorm params stay f32 (they feed f32 elementwise)."""
    out = dict(params)
    names = ["wk", "wv", "wo", "w1", "w2"]
    if not kq_same:
        names.append("wq")
    for n in names:
        if n in out:
            out[n] = out[n].astype(compute_dtype)
    return out


def transformer_layer(mask_int, query, key, values, params, *, n_heads, d_k,
                      kq_same=True, apply_pos=True,
                      compute_dtype=jnp.bfloat16, batch_tile=None):
    B, S, D = query.shape
    assert D == n_heads * d_k, "d_model must equal n_heads * d_k"
    mask_k = int(mask_int)
    zero_pad = (mask_k == 0)
    d_ff = params["w1"].shape[1]
    cdt = jnp.dtype(compute_dtype)

    def as_compute(w):
        # Prefer pre-casting ONCE via prepare_params(); this is a safety net
        # only (it costs an extra HBM pass when hit).
        return w if w.dtype == cdt else w.astype(compute_dtype)

    weight_args = []
    if not kq_same:
        weight_args += [as_compute(params["wq"]), params["bq"]]
    weight_args += [
        as_compute(params["wk"]), params["bk"],
        as_compute(params["wv"]), params["bv"],
        as_compute(params["wo"]), params["bo"],
        params["ln1_g"], params["ln1_b"],
        as_compute(params["w1"]), params["b1"],
        as_compute(params["w2"]), params["b2"],
        params["ln2_g"], params["ln2_b"],
    ]
    args = (query, key, values, *weight_args)

    # --- VMEM-aware tiling policy (per-generation, not hard-coded) ----------
    phys_vmem = _physical_vmem_bytes()
    weight_bytes = sum(int(a.size) * a.dtype.itemsize for a in weight_args)
    in_item = query.dtype.itemsize
    out_item = query.dtype.itemsize

    def footprint(bt_):
        return _step_vmem_bytes(bt_, S, D, d_ff, weight_bytes, in_item,
                                out_item, cdt.itemsize, apply_pos)

    if batch_tile is None:
        bt = _pick_batch_tile(B, S, lambda t: footprint(t) <= 0.70 * phys_vmem)
    else:
        bt = int(batch_tile)
    assert B % bt == 0, "batch tile must divide the batch"

    # Limit derived from the real per-step footprint (+ slack so the
    # double-buffered-weights fallback still fits), clamped under physical.
    vmem_limit = max(32 * 1024 * 1024, int(1.2 * footprint(bt)) + weight_bytes)
    vmem_limit = min(vmem_limit, int(0.875 * phys_vmem))

    kernel = _make_kernel(
        kq_same, n_heads=n_heads, d_k=d_k, mask_k=mask_k, zero_pad=zero_pad,
        apply_pos=apply_pos, compute_dtype=compute_dtype,
        approx_recip=(cdt != jnp.dtype(jnp.float32)))

    # Advisory cost estimate so XLA schedules around the custom call.
    mm_flops = 8 * B * S * D * D + 4 * B * S * S * D
    if apply_pos:
        mm_flops += 4 * B * S * D * d_ff
    transcendentals = B * n_heads * S * S + 4 * B * S
    bytes_accessed = sum(int(a.size) * a.dtype.itemsize for a in args)
    bytes_accessed += B * S * D * query.dtype.itemsize

    def run(single_buffer_weights):
        act_spec = pl.BlockSpec((bt, S, D), lambda b: (b, 0, 0))

        def full_spec(a):  # resident weights: constant index map, fetched once
            idx = lambda b, _nd=a.ndim: (0,) * _nd
            if single_buffer_weights:
                # Never re-fetched -> one buffer is enough; halves weight VMEM.
                return pl.BlockSpec(a.shape, idx, pipeline_mode=pl.Buffered(1))
            return pl.BlockSpec(a.shape, idx)

        in_specs = [act_spec, act_spec, act_spec]
        in_specs += [full_spec(a) for a in weight_args]

        return pl.pallas_call(
            kernel,
            out_shape=jax.ShapeDtypeStruct((B, S, D), query.dtype),
            grid_spec=pltpu.PrefetchScalarGridSpec(
                num_scalar_prefetch=0,
                grid=(B // bt,),
                in_specs=in_specs,
                out_specs=pl.BlockSpec((bt, S, D), lambda b: (b, 0, 0)),
                scratch_shapes=[
                    pltpu.VMEM((bt, S, D), compute_dtype),   # q projection
                    pltpu.VMEM((bt, S, D), compute_dtype),   # k projection
                    pltpu.VMEM((bt, S, D), compute_dtype),   # v projection
                    pltpu.VMEM((bt, S, D), compute_dtype),   # concat'd heads
                ]),
            compiler_params=pltpu.CompilerParams(
                dimension_semantics=("parallel",),
                vmem_limit_bytes=int(vmem_limit)),
            cost_estimate=pl.CostEstimate(
                flops=int(mm_flops),
                transcendentals=int(transcendentals),
                bytes_accessed=int(bytes_accessed)),
        )(*args)

    try:
        return run(single_buffer_weights=True)
    except Exception:
        # pipeline_mode=pl.Buffered(1) not supported by this jax version ->
        # fall back to default double-buffered weight specs.
        return run(single_buffer_weights=False)


# ------------------------- parameters & reference ---------------------------

def init_params(key, d_model, d_ff):
    ks = jax.random.split(key, 6)

    def xav(k, fan_in, fan_out):
        bound = math.sqrt(6.0 / (fan_in + fan_out))
        return jax.random.uniform(k, (fan_in, fan_out), jnp.float32, -bound, bound)

    zeros = lambda n: jnp.zeros((1, n), jnp.float32)
    ones = lambda n: jnp.ones((1, n), jnp.float32)
    return {
        "wq": xav(ks[0], d_model, d_model), "bq": zeros(d_model),
        "wk": xav(ks[1], d_model, d_model), "bk": zeros(d_model),
        "wv": xav(ks[2], d_model, d_model), "bv": zeros(d_model),
        "wo": xav(ks[3], d_model, d_model), "bo": zeros(d_model),
        "ln1_g": ones(d_model), "ln1_b": zeros(d_model),
        "w1": xav(ks[4], d_model, d_ff), "b1": zeros(d_ff),
        "w2": xav(ks[5], d_ff, d_model), "b2": zeros(d_model),
        "ln2_g": ones(d_model), "ln2_b": zeros(d_model),
    }


def ref_forward(mask_int, q, k, v, params, *, n_heads, d_k, kq_same=True,
                apply_pos=True):
    B, S, D = q.shape
    mm = functools.partial(jnp.einsum, precision=jax.lax.Precision.HIGHEST)
    wq = params["wk"] if kq_same else params["wq"]
    bq = params["bk"] if kq_same else params["bq"]
    qp = mm("bsd,de->bse", q, wq) + bq
    kp = mm("bsd,de->bse", k, params["wk"]) + params["bk"]
    vp = mm("bsd,de->bse", v, params["wv"]) + params["bv"]

    def split(x):
        return x.reshape(B, S, n_heads, d_k).transpose(0, 2, 1, 3)

    qh, kh, vh = split(qp), split(kp), split(vp)
    scores = mm("bhqd,bhkd->bhqk", qh, kh) / math.sqrt(d_k)
    r = jnp.arange(S)[:, None]
    c = jnp.arange(S)[None, :]
    valid = c < (r + mask_int)
    scores = jnp.where(valid[None, None], scores, -1e32)
    p = jax.nn.softmax(scores, axis=-1)
    if mask_int == 0:
        p = p.at[:, :, 0, :].set(0.0)
    attn = mm("bhqk,bhkd->bhqd", p, vh).transpose(0, 2, 1, 3).reshape(B, S, D)
    x = q + (mm("bsd,de->bse", attn, params["wo"]) + params["bo"])

    def ln(y, g, b):
        mu = y.mean(-1, keepdims=True)
        var = ((y - mu) ** 2).mean(-1, keepdims=True)
        return (y - mu) / jnp.sqrt(var + 1e-5) * g + b

    x = ln(x, params["ln1_g"], params["ln1_b"])
    if apply_pos:
        h1 = jnp.maximum(mm("bsd,df->bsf", x, params["w1"]) + params["b1"], 0.0)
        ff = mm("bsf,fd->bsd", h1, params["w2"]) + params["b2"]
        x = ln(x + ff, params["ln2_g"], params["ln2_b"])
    return x


if __name__ == "__main__":
    B, S, D = 2, 8, 32
    n_heads, d_ff = 2, 64
    d_k = D // n_heads
    mask_int = 0          # mask==0 path: strict-causal mask + zero_pad=True
    kq_same = True

    key = jax.random.PRNGKey(0)
    kq, kk, kv, kp = jax.random.split(key, 4)
    query = jax.random.normal(kq, (B, S, D), jnp.float32)
    key_in = jax.random.normal(kk, (B, S, D), jnp.float32)
    values = jax.random.normal(kv, (B, S, D), jnp.float32)
    params = init_params(kp, D, d_ff)

    ref = ref_forward(mask_int, query, key_in, values, params,
                      n_heads=n_heads, d_k=d_k, kq_same=kq_same, apply_pos=True)

    # Exact-semantics check: f32 MXU path must track the f32 reference tightly.
    out_f32 = transformer_layer(mask_int, query, key_in, values, params,
                                n_heads=n_heads, d_k=d_k, kq_same=kq_same,
                                apply_pos=True, compute_dtype=jnp.float32)
    out_f32 = jax.block_until_ready(out_f32)
    assert out_f32.shape == (B, S, D)
    err_f32 = float(jnp.max(jnp.abs(out_f32 - ref)))
    assert err_f32 < 1e-3, f"f32 path mismatch: max abs err = {err_f32}"

    # Fast path: bf16 MXU operands (softmax / LayerNorm / residual stay f32).
    params_bf16 = prepare_params(params, jnp.bfloat16, kq_same=kq_same)
    out_bf16 = transformer_layer(mask_int, query, key_in, values, params_bf16,
                                 n_heads=n_heads, d_k=d_k, kq_same=kq_same,
                                 apply_pos=True, compute_dtype=jnp.bfloat16)
    out_bf16 = jax.block_until_ready(out_bf16)
    assert out_bf16.shape == (B, S, D)
    err_bf16 = float(jnp.max(jnp.abs(out_bf16 - ref)))
    assert err_bf16 < 0.15, f"bf16 path mismatch: max abs err = {err_bf16}"

    print("KERNEL_OK")
</pallas_src>

<mosaic_0001>
module attributes {stable_mosaic.version = 11 : i64} {
  func.func @kernel(%arg0: i32, %arg1: memref<2x8x32xf32, #tpu.memory_space<vmem>>, %arg2: memref<2x8x32xf32, #tpu.memory_space<vmem>>, %arg3: memref<2x8x32xf32, #tpu.memory_space<vmem>>, %arg4: memref<32x32xf32, #tpu.memory_space<vmem>>, %arg5: memref<1x32xf32, #tpu.memory_space<vmem>>, %arg6: memref<32x32xf32, #tpu.memory_space<vmem>>, %arg7: memref<1x32xf32, #tpu.memory_space<vmem>>, %arg8: memref<32x32xf32, #tpu.memory_space<vmem>>, %arg9: memref<1x32xf32, #tpu.memory_space<vmem>>, %arg10: memref<1x32xf32, #tpu.memory_space<vmem>>, %arg11: memref<1x32xf32, #tpu.memory_space<vmem>>, %arg12: memref<32x64xf32, #tpu.memory_space<vmem>>, %arg13: memref<1x64xf32, #tpu.memory_space<vmem>>, %arg14: memref<64x32xf32, #tpu.memory_space<vmem>>, %arg15: memref<1x32xf32, #tpu.memory_space<vmem>>, %arg16: memref<1x32xf32, #tpu.memory_space<vmem>>, %arg17: memref<1x32xf32, #tpu.memory_space<vmem>>, %arg18: memref<2x8x32xf32, #tpu.memory_space<vmem>>, %arg19: memref<2x8x32xf32, #tpu.memory_space<vmem>>, %arg20: memref<2x8x32xf32, #tpu.memory_space<vmem>>, %arg21: memref<2x8x32xf32, #tpu.memory_space<vmem>>, %arg22: memref<2x8x32xf32, #tpu.memory_space<vmem>>) attributes {dimension_semantics = [#tpu.dimension_semantics<parallel>], iteration_bounds = array<i64: 1>, scalar_prefetch = 0 : i64, scratch_operands = 4 : i64, tpu.core_type = #tpu.core_type<tc>, window_params = [{transform_indices = @transform_0, window_bounds = array<i64: 2, 8, 32>}, {transform_indices = @transform_1, window_bounds = array<i64: 2, 8, 32>}, {transform_indices = @transform_2, window_bounds = array<i64: 2, 8, 32>}, {pipeline_mode = #tpu.pipeline_mode<synchronous>, transform_indices = @transform_3, window_bounds = array<i64: 32, 32>}, {pipeline_mode = #tpu.pipeline_mode<synchronous>, transform_indices = @transform_4, window_bounds = array<i64: 1, 32>}, {pipeline_mode = #tpu.pipeline_mode<synchronous>, transform_indices = @transform_5, window_bounds = array<i64: 32, 32>}, {pipeline_mode = #tpu.pipeline_mode<synchronous>, transform_indices = @transform_6, window_bounds = array<i64: 1, 32>}, {pipeline_mode = #tpu.pipeline_mode<synchronous>, transform_indices = @transform_7, window_bounds = array<i64: 32, 32>}, {pipeline_mode = #tpu.pipeline_mode<synchronous>, transform_indices = @transform_8, window_bounds = array<i64: 1, 32>}, {pipeline_mode = #tpu.pipeline_mode<synchronous>, transform_indices = @transform_9, window_bounds = array<i64: 1, 32>}, {pipeline_mode = #tpu.pipeline_mode<synchronous>, transform_indices = @transform_10, window_bounds = array<i64: 1, 32>}, {pipeline_mode = #tpu.pipeline_mode<synchronous>, transform_indices = @transform_11, window_bounds = array<i64: 32, 64>}, {pipeline_mode = #tpu.pipeline_mode<synchronous>, transform_indices = @transform_12, window_bounds = array<i64: 1, 64>}, {pipeline_mode = #tpu.pipeline_mode<synchronous>, transform_indices = @transform_13, window_bounds = array<i64: 64, 32>}, {pipeline_mode = #tpu.pipeline_mode<synchronous>, transform_indices = @transform_14, window_bounds = array<i64: 1, 32>}, {pipeline_mode = #tpu.pipeline_mode<synchronous>, transform_indices = @transform_15, window_bounds = array<i64: 1, 32>}, {pipeline_mode = #tpu.pipeline_mode<synchronous>, transform_indices = @transform_16, window_bounds = array<i64: 1, 32>}, {transform_indices = @transform_17, window_bounds = array<i64: 2, 8, 32>}]} {
    %c0 = arith.constant 0 : index
    %c0_0 = arith.constant 0 : index
    %c0_1 = arith.constant 0 : index
    %0 = vector.load %arg1[%c0, %c0_0, %c0_1] : memref<2x8x32xf32, #tpu.memory_space<vmem>>, vector<2x8x32xf32>
    %1 = vector.shape_cast %0 : vector<2x8x32xf32> to vector<16x32xf32>
    %c0_2 = arith.constant 0 : index
    %c0_3 = arith.constant 0 : index
    %c0_4 = arith.constant 0 : index
    %2 = vector.load %arg2[%c0_2, %c0_3, %c0_4] : memref<2x8x32xf32, #tpu.memory_space<vmem>>, vector<2x8x32xf32>
    %3 = vector.shape_cast %2 : vector<2x8x32xf32> to vector<16x32xf32>
    %c0_5 = arith.constant 0 : index
    %c0_6 = arith.constant 0 : index
    %c0_7 = arith.constant 0 : index
    %4 = vector.load %arg3[%c0_5, %c0_6, %c0_7] : memref<2x8x32xf32, #tpu.memory_space<vmem>>, vector<2x8x32xf32>
    %5 = vector.shape_cast %4 : vector<2x8x32xf32> to vector<16x32xf32>
    %6 = tpu.concatenate %1, %3 in 0 : vector<16x32xf32>, vector<16x32xf32> -> vector<32x32xf32>
    %c0_8 = arith.constant 0 : index
    %c0_9 = arith.constant 0 : index
    %7 = vector.load %arg4[%c0_8, %c0_9] : memref<32x32xf32, #tpu.memory_space<vmem>>, vector<32x32xf32>
    %cst = arith.constant dense<0.000000e+00> : vector<32x32xf32>
    %8 = tpu.matmul %6, %7, %cst {dimension_numbers = #tpu.dot_dimension_numbers<[1], [0], [0], [1], [0, 0, 1, 1], [], []>} : vector<32x32xf32>, vector<32x32xf32>, vector<32x32xf32> -> vector<32x32xf32>
    %c0_10 = arith.constant 0 : index
    %c0_11 = arith.constant 0 : index
    %9 = vector.load %arg5[%c0_10, %c0_11] : memref<1x32xf32, #tpu.memory_space<vmem>>, vector<1x32xf32>
    %10 = vector.broadcast %9 : vector<1x32xf32> to vector<32x32xf32>
    %11 = arith.addf %8, %10 : vector<32x32xf32>
    %12 = vector.extract_strided_slice %11 {offsets = [0, 0], sizes = [16, 32], strides = [1, 1]} : vector<32x32xf32> to vector<16x32xf32>
    %13 = vector.extract_strided_slice %11 {offsets = [16, 0], sizes = [16, 32], strides = [1, 1]} : vector<32x32xf32> to vector<16x32xf32>
    %c0_12 = arith.constant 0 : index
    %c0_13 = arith.constant 0 : index
    %14 = vector.load %arg6[%c0_12, %c0_13] : memref<32x32xf32, #tpu.memory_space<vmem>>, vector<32x32xf32>
    %cst_14 = arith.constant dense<0.000000e+00> : vector<16x32xf32>
    %15 = tpu.matmul %5, %14, %cst_14 {dimension_numbers = #tpu.dot_dimension_numbers<[1], [0], [0], [1], [0, 0, 1, 1], [], []>} : vector<16x32xf32>, vector<32x32xf32>, vector<16x32xf32> -> vector<16x32xf32>
    %c0_15 = arith.constant 0 : index
    %c0_16 = arith.constant 0 : index
    %16 = vector.load %arg7[%c0_15, %c0_16] : memref<1x32xf32, #tpu.memory_space<vmem>>, vector<1x32xf32>
    %17 = vector.broadcast %16 : vector<1x32xf32> to vector<16x32xf32>
    %18 = arith.addf %15, %17 : vector<16x32xf32>
    %cst_17 = arith.constant 2.500000e-01 : f32
    %19 = vector.broadcast %cst_17 : f32 to vector<16x32xf32>
    %20 = arith.mulf %12, %19 : vector<16x32xf32>
    %21 = vector.shape_cast %20 : vector<16x32xf32> to vector<2x8x32xf32>
    %c0_18 = arith.constant 0 : index
    %c0_19 = arith.constant 0 : index
    %c0_20 = arith.constant 0 : index
    %22 = vector.load %arg19[%c0_18, %c0_19, %c0_20] : memref<2x8x32xf32, #tpu.memory_space<vmem>>, vector<2x8x32xf32>
    tpu.vector_store %arg19[%c0_18, %c0_19, %c0_20], %21 {strides = array<i32>} : memref<2x8x32xf32, #tpu.memory_space<vmem>>, vector<2x8x32xf32>,
    %23 = vector.shape_cast %13 : vector<16x32xf32> to vector<2x8x32xf32>
    %c0_21 = arith.constant 0 : index
    %c0_22 = arith.constant 0 : index
    %c0_23 = arith.constant 0 : index
    %24 = vector.load %arg20[%c0_21, %c0_22, %c0_23] : memref<2x8x32xf32, #tpu.memory_space<vmem>>, vector<2x8x32xf32>
    tpu.vector_store %arg20[%c0_21, %c0_22, %c0_23], %23 {strides = array<i32>} : memref<2x8x32xf32, #tpu.memory_space<vmem>>, vector<2x8x32xf32>,
    %25 = vector.shape_cast %18 : vector<16x32xf32> to vector<2x8x32xf32>
    %c0_24 = arith.constant 0 : index
    %c0_25 = arith.constant 0 : index
    %c0_26 = arith.constant 0 : index
    %26 = vector.load %arg21[%c0_24, %c0_25, %c0_26] : memref<2x8x32xf32, #tpu.memory_space<vmem>>, vector<2x8x32xf32>
    tpu.vector_store %arg21[%c0_24, %c0_25, %c0_26], %25 {strides = array<i32>} : memref<2x8x32xf32, #tpu.memory_space<vmem>>, vector<2x8x32xf32>,
    %27 = tpu.iota {dimensions = array<i32: 0>} : vector<8x8xi32>
    %28 = tpu.iota {dimensions = array<i32: 1>} : vector<8x8xi32>
    %c0_i32 = arith.constant 0 : i32
    %29 = vector.broadcast %c0_i32 : i32 to vector<8x8xi32>
    %30 = arith.addi %27, %29 : vector<8x8xi32>
    %31 = arith.cmpi slt, %28, %30 : vector<8x8xi32>
    %32 = vector.shape_cast %31 : vector<8x8xi1> to vector<1x8x8xi1>
    %c0_i32_27 = arith.constant 0 : i32
    %33 = vector.broadcast %c0_i32_27 : i32 to vector<8x8xi32>
    %34 = arith.cmpi eq, %27, %33 : vector<8x8xi32>
    %35 = vector.shape_cast %34 : vector<8x8xi1> to vector<1x8x8xi1>
    %c0_28 = arith.constant 0 : index
    %c0_29 = arith.constant 0 : index
    %c0_30 = arith.constant 0 : index
    %36 = vector.load %arg19[%c0_28, %c0_29, %c0_30] : memref<2x8x32xf32, #tpu.memory_space<vmem>>, vector<2x8x16xf32>
    %c0_31 = arith.constant 0 : index
    %c0_32 = arith.constant 0 : index
    %c0_33 = arith.constant 0 : index
    %37 = vector.load %arg20[%c0_31, %c0_32, %c0_33] : memref<2x8x32xf32, #tpu.memory_space<vmem>>, vector<2x8x16xf32>
    %c0_34 = arith.constant 0 : index
    %c0_35 = arith.constant 0 : index
    %c0_36 = arith.constant 0 : index
    %38 = vector.load %arg21[%c0_34, %c0_35, %c0_36] : memref<2x8x32xf32, #tpu.memory_space<vmem>>, vector<2x8x16xf32>
    "tpu.trace_start"() <{level = 10 : i32, message = "bqd,bkd->bqk"}> : () -> ()
    %cst_37 = arith.constant dense<0.000000e+00> : vector<2x8x8xf32>
    %39 = tpu.matmul %36, %37, %cst_37 {dimension_numbers = #tpu.dot_dimension_numbers<[2], [2], [1], [1], [0, 0, 0, 1, 1, 1], [0], [0]>} : vector<2x8x16xf32>, vector<2x8x16xf32>, vector<2x8x8xf32> -> vector<2x8x8xf32>
    %cst_38 = arith.constant -1.000000e+32 : f32
    "tpu.trace_stop"() : () -> ()
    %40 = vector.shape_cast %32 : vector<1x8x8xi1> to vector<1x8x8xi1>
    %41 = vector.broadcast %40 : vector<1x8x8xi1> to vector<2x8x8xi1>
    %42 = vector.broadcast %cst_38 : f32 to vector<2x8x8xf32>
    %43 = arith.select %41, %39, %42 : vector<2x8x8xi1>, vector<2x8x8xf32>
    %cst_39 = arith.constant dense<0xFF800000> : vector<2x8xf32>
    %44 = vector.multi_reduction <maximumf>, %43, %cst_39 [2] : vector<2x8x8xf32> to vector<2x8xf32>
    %45 = vector.shape_cast %44 : vector<2x8xf32> to vector<2x8x1xf32>
    %46 = vector.broadcast %45 : vector<2x8x1xf32> to vector<2x8x8xf32>
    %47 = arith.subf %43, %46 : vector<2x8x8xf32>
    %48 = math.exp %47 : vector<2x8x8xf32>
    %cst_40 = arith.constant dense<0.000000e+00> : vector<2x8xf32>
    %49 = vector.multi_reduction <add>, %48, %cst_40 [2] : vector<2x8x8xf32> to vector<2x8xf32>
    %50 = vector.shape_cast %49 : vector<2x8xf32> to vector<2x8x1xf32>
    %cst_41 = arith.constant 0.000000e+00 : f32
    %51 = vector.shape_cast %35 : vector<1x8x8xi1> to vector<1x8x8xi1>
    %52 = vector.broadcast %51 : vector<1x8x8xi1> to vector<2x8x8xi1>
    %53 = vector.broadcast %cst_41 : f32 to vector<2x8x8xf32>
    %54 = arith.select %52, %53, %48 : vector<2x8x8xi1>, vector<2x8x8xf32>
    "tpu.trace_start"() <{level = 10 : i32, message = "bqk,bkd->bqd"}> : () -> ()
    %cst_42 = arith.constant dense<0.000000e+00> : vector<2x8x16xf32>
    %55 = tpu.matmul %54, %38, %cst_42 {dimension_numbers = #tpu.dot_dimension_numbers<[2], [1], [1], [2], [0, 0, 0, 1, 1, 2], [0], [0]>} : vector<2x8x8xf32>, vector<2x8x16xf32>, vector<2x8x16xf32> -> vector<2x8x16xf32>
    "tpu.trace_stop"() : () -> ()
    %56 = vector.broadcast %50 : vector<2x8x1xf32> to vector<2x8x16xf32>
    %57 = arith.divf %55, %56 : vector<2x8x16xf32>
    %c0_43 = arith.constant 0 : index
    %c0_44 = arith.constant 0 : index
    %c0_45 = arith.constant 0 : index
    %58 = vector.load %arg22[%c0_43, %c0_44, %c0_45] : memref<2x8x32xf32, #tpu.memory_space<vmem>>, vector<2x8x16xf32>
    tpu.vector_store %arg22[%c0_43, %c0_44, %c0_45], %57 {strides = array<i32>} : memref<2x8x32xf32, #tpu.memory_space<vmem>>, vector<2x8x16xf32>,
    %c0_46 = arith.constant 0 : index
    %c0_47 = arith.constant 0 : index
    %c16 = arith.constant 16 : index
    %59 = vector.load %arg19[%c0_46, %c0_47, %c16] : memref<2x8x32xf32, #tpu.memory_space<vmem>>, vector<2x8x16xf32>
    %c0_48 = arith.constant 0 : index
    %c0_49 = arith.constant 0 : index
    %c16_50 = arith.constant 16 : index
    %60 = vector.load %arg20[%c0_48, %c0_49, %c16_50] : memref<2x8x32xf32, #tpu.memory_space<vmem>>, vector<2x8x16xf32>
    %c0_51 = arith.constant 0 : index
    %c0_52 = arith.constant 0 : index
    %c16_53 = arith.constant 16 : index
    %61 = vector.load %arg21[%c0_51, %c0_52, %c16_53] : memref<2x8x32xf32, #tpu.memory_space<vmem>>, vector<2x8x16xf32>
    "tpu.trace_start"() <{level = 10 : i32, message = "bqd,bkd->bqk"}> : () -> ()
    %cst_54 = arith.constant dense<0.000000e+00> : vector<2x8x8xf32>
    %62 = tpu.matmul %59, %60, %cst_54 {dimension_numbers = #tpu.dot_dimension_numbers<[2], [2], [1], [1], [0, 0, 0, 1, 1, 1], [0], [0]>} : vector<2x8x16xf32>, vector<2x8x16xf32>, vector<2x8x8xf32> -> vector<2x8x8xf32>
    %cst_55 = arith.constant -1.000000e+32 : f32
    "tpu.trace_stop"() : () -> ()
    %63 = vector.shape_cast %32 : vector<1x8x8xi1> to vector<1x8x8xi1>
    %64 = vector.broadcast %63 : vector<1x8x8xi1> to vector<2x8x8xi1>
    %65 = vector.broadcast %cst_55 : f32 to vector<2x8x8xf32>
    %66 = arith.select %64, %62, %65 : vector<2x8x8xi1>, vector<2x8x8xf32>
    %cst_56 = arith.constant dense<0xFF800000> : vector<2x8xf32>
    %67 = vector.multi_reduction <maximumf>, %66, %cst_56 [2] : vector<2x8x8xf32> to vector<2x8xf32>
    %68 = vector.shape_cast %67 : vector<2x8xf32> to vector<2x8x1xf32>
    %69 = vector.broadcast %68 : vector<2x8x1xf32> to vector<2x8x8xf32>
    %70 = arith.subf %66, %69 : vector<2x8x8xf32>
    %71 = math.exp %70 : vector<2x8x8xf32>
    %cst_57 = arith.constant dense<0.000000e+00> : vector<2x8xf32>
    %72 = vector.multi_reduction <add>, %71, %cst_57 [2] : vector<2x8x8xf32> to vector<2x8xf32>
    %73 = vector.shape_cast %72 : vector<2x8xf32> to vector<2x8x1xf32>
    %cst_58 = arith.constant 0.000000e+00 : f32
    %74 = vector.shape_cast %35 : vector<1x8x8xi1> to vector<1x8x8xi1>
    %75 = vector.broadcast %74 : vector<1x8x8xi1> to vector<2x8x8xi1>
    %76 = vector.broadcast %cst_58 : f32 to vector<2x8x8xf32>
    %77 = arith.select %75, %76, %71 : vector<2x8x8xi1>, vector<2x8x8xf32>
    "tpu.trace_start"() <{level = 10 : i32, message = "bqk,bkd->bqd"}> : () -> ()
    %cst_59 = arith.constant dense<0.000000e+00> : vector<2x8x16xf32>
    %78 = tpu.matmul %77, %61, %cst_59 {dimension_numbers = #tpu.dot_dimension_numbers<[2], [1], [1], [2], [0, 0, 0, 1, 1, 2], [0], [0]>} : vector<2x8x8xf32>, vector<2x8x16xf32>, vector<2x8x16xf32> -> vector<2x8x16xf32>
    "tpu.trace_stop"() : () -> ()
    %79 = vector.broadcast %73 : vector<2x8x1xf32> to vector<2x8x16xf32>
    %80 = arith.divf %78, %79 : vector<2x8x16xf32>
    %c0_60 = arith.constant 0 : index
    %c0_61 = arith.constant 0 : index
    %c16_62 = arith.constant 16 : index
    %81 = vector.load %arg22[%c0_60, %c0_61, %c16_62] : memref<2x8x32xf32, #tpu.memory_space<vmem>>, vector<2x8x16xf32>
    tpu.vector_store %arg22[%c0_60, %c0_61, %c16_62], %80 {strides = array<i32>} : memref<2x8x32xf32, #tpu.memory_space<vmem>>, vector<2x8x16xf32>,
    %c0_63 = arith.constant 0 : index
    %c0_64 = arith.constant 0 : index
    %c0_65 = arith.constant 0 : index
    %82 = vector.load %arg22[%c0_63, %c0_64, %c0_65] : memref<2x8x32xf32, #tpu.memory_space<vmem>>, vector<2x8x32xf32>
    %83 = vector.shape_cast %82 : vector<2x8x32xf32> to vector<16x32xf32>
    %c0_66 = arith.constant 0 : index
    %c0_67 = arith.constant 0 : index
    %84 = vector.load %arg8[%c0_66, %c0_67] : memref<32x32xf32, #tpu.memory_space<vmem>>, vector<32x32xf32>
    %cst_68 = arith.constant dense<0.000000e+00> : vector<16x32xf32>
    %85 = tpu.matmul %83, %84, %cst_68 {dimension_numbers = #tpu.dot_dimension_numbers<[1], [0], [0], [1], [0, 0, 1, 1], [], []>} : vector<16x32xf32>, vector<32x32xf32>, vector<16x32xf32> -> vector<16x32xf32>
    %86 = arith.addf %1, %85 : vector<16x32xf32>
    %c0_69 = arith.constant 0 : index
    %c0_70 = arith.constant 0 : index
    %87 = vector.load %arg9[%c0_69, %c0_70] : memref<1x32xf32, #tpu.memory_space<vmem>>, vector<1x32xf32>
    %88 = vector.broadcast %87 : vector<1x32xf32> to vector<16x32xf32>
    %89 = arith.addf %86, %88 : vector<16x32xf32>
    %c0_71 = arith.constant 0 : index
    %c0_72 = arith.constant 0 : index
    %90 = vector.load %arg10[%c0_71, %c0_72] : memref<1x32xf32, #tpu.memory_space<vmem>>, vector<1x32xf32>
    %c0_73 = arith.constant 0 : index
    %c0_74 = arith.constant 0 : index
    %91 = vector.load %arg11[%c0_73, %c0_74] : memref<1x32xf32, #tpu.memory_space<vmem>>, vector<1x32xf32>
    %cst_75 = arith.constant dense<0.000000e+00> : vector<16xf32>
    %92 = vector.multi_reduction <add>, %89, %cst_75 [1] : vector<16x32xf32> to vector<16xf32>
    %93 = vector.shape_cast %92 : vector<16xf32> to vector<16x1xf32>
    %cst_76 = arith.constant 3.200000e+01 : f32
    %94 = vector.broadcast %cst_76 : f32 to vector<16x1xf32>
    %95 = arith.divf %93, %94 : vector<16x1xf32>
    %96 = vector.broadcast %95 : vector<16x1xf32> to vector<16x32xf32>
    %97 = arith.subf %89, %96 : vector<16x32xf32>
    %98 = arith.mulf %97, %97 : vector<16x32xf32>
    %cst_77 = arith.constant dense<0.000000e+00> : vector<16xf32>
    %99 = vector.multi_reduction <add>, %98, %cst_77 [1] : vector<16x32xf32> to vector<16xf32>
    %100 = vector.shape_cast %99 : vector<16xf32> to vector<16x1xf32>
    %cst_78 = arith.constant 3.200000e+01 : f32
    %101 = vector.broadcast %cst_78 : f32 to vector<16x1xf32>
    %102 = arith.divf %100, %101 : vector<16x1xf32>
    %103 = vector.broadcast %95 : vector<16x1xf32> to vector<16x32xf32>
    %104 = arith.subf %89, %103 : vector<16x32xf32>
    %cst_79 = arith.constant 9.99999974E-6 : f32
    %105 = vector.broadcast %cst_79 : f32 to vector<16x1xf32>
    %106 = arith.addf %102, %105 : vector<16x1xf32>
    %107 = math.rsqrt %106 : vector<16x1xf32>
    %108 = vector.broadcast %107 : vector<16x1xf32> to vector<16x32xf32>
    %109 = arith.mulf %104, %108 : vector<16x32xf32>
    %110 = vector.broadcast %90 : vector<1x32xf32> to vector<16x32xf32>
    %111 = arith.mulf %109, %110 : vector<16x32xf32>
    %112 = vector.broadcast %91 : vector<1x32xf32> to vector<16x32xf32>
    %113 = arith.addf %111, %112 : vector<16x32xf32>
    %c0_80 = arith.constant 0 : index
    %c0_81 = arith.constant 0 : index
    %114 = vector.load %arg12[%c0_80, %c0_81] : memref<32x64xf32, #tpu.memory_space<vmem>>, vector<32x64xf32>
    %cst_82 = arith.constant dense<0.000000e+00> : vector<16x64xf32>
    %115 = tpu.matmul %113, %114, %cst_82 {dimension_numbers = #tpu.dot_dimension_numbers<[1], [0], [0], [1], [0, 0, 1, 1], [], []>} : vector<16x32xf32>, vector<32x64xf32>, vector<16x64xf32> -> vector<16x64xf32>
    %c0_83 = arith.constant 0 : index
    %c0_84 = arith.constant 0 : index
    %116 = vector.load %arg13[%c0_83, %c0_84] : memref<1x64xf32, #tpu.memory_space<vmem>>, vector<1x64xf32>
    %117 = vector.broadcast %116 : vector<1x64xf32> to vector<16x64xf32>
    %118 = arith.addf %115, %117 : vector<16x64xf32>
    %cst_85 = arith.constant 0.000000e+00 : f32
    %119 = vector.broadcast %cst_85 : f32 to vector<16x64xf32>
    %120 = arith.maximumf %118, %119 : vector<16x64xf32>
    %c0_86 = arith.constant 0 : index
    %c0_87 = arith.constant 0 : index
    %121 = vector.load %arg14[%c0_86, %c0_87] : memref<64x32xf32, #tpu.memory_space<vmem>>, vector<64x32xf32>
    %cst_88 = arith.constant dense<0.000000e+00> : vector<16x32xf32>
    %122 = tpu.matmul %120, %121, %cst_88 {dimension_numbers = #tpu.dot_dimension_numbers<[1], [0], [0], [1], [0, 0, 1, 1], [], []>} : vector<16x64xf32>, vector<64x32xf32>, vector<16x32xf32> -> vector<16x32xf32>
    %c0_89 = arith.constant 0 : index
    %c0_90 = arith.constant 0 : index
    %123 = vector.load %arg15[%c0_89, %c0_90] : memref<1x32xf32, #tpu.memory_space<vmem>>, vector<1x32xf32>
    %124 = vector.broadcast %123 : vector<1x32xf32> to vector<16x32xf32>
    %125 = arith.addf %122, %124 : vector<16x32xf32>
    %126 = arith.addf %113, %125 : vector<16x32xf32>
    %c0_91 = arith.constant 0 : index
    %c0_92 = arith.constant 0 : index
    %127 = vector.load %arg16[%c0_91, %c0_92] : memref<1x32xf32, #tpu.memory_space<vmem>>, vector<1x32xf32>
    %c0_93 = arith.constant 0 : index
    %c0_94 = arith.constant 0 : index
    %128 = vector.load %arg17[%c0_93, %c0_94] : memref<1x32xf32, #tpu.memory_space<vmem>>, vector<1x32xf32>
    %cst_95 = arith.constant dense<0.000000e+00> : vector<16xf32>
    %129 = vector.multi_reduction <add>, %126, %cst_95 [1] : vector<16x32xf32> to vector<16xf32>
    %130 = vector.shape_cast %129 : vector<16xf32> to vector<16x1xf32>
    %cst_96 = arith.constant 3.200000e+01 : f32
    %131 = vector.broadcast %cst_96 : f32 to vector<16x1xf32>
    %132 = arith.divf %130, %131 : vector<16x1xf32>
    %133 = vector.broadcast %132 : vector<16x1xf32> to vector<16x32xf32>
    %134 = arith.subf %126, %133 : vector<16x32xf32>
    %135 = arith.mulf %134, %134 : vector<16x32xf32>
    %cst_97 = arith.constant dense<0.000000e+00> : vector<16xf32>
    %136 = vector.multi_reduction <add>, %135, %cst_97 [1] : vector<16x32xf32> to vector<16xf32>
    %137 = vector.shape_cast %136 : vector<16xf32> to vector<16x1xf32>
    %cst_98 = arith.constant 3.200000e+01 : f32
    %138 = vector.broadcast %cst_98 : f32 to vector<16x1xf32>
    %139 = arith.divf %137, %138 : vector<16x1xf32>
    %140 = vector.broadcast %132 : vector<16x1xf32> to vector<16x32xf32>
    %141 = arith.subf %126, %140 : vector<16x32xf32>
    %cst_99 = arith.constant 9.99999974E-6 : f32
    %142 = vector.broadcast %cst_99 : f32 to vector<16x1xf32>
    %143 = arith.addf %139, %142 : vector<16x1xf32>
    %144 = math.rsqrt %143 : vector<16x1xf32>
    %145 = vector.broadcast %144 : vector<16x1xf32> to vector<16x32xf32>
    %146 = arith.mulf %141, %145 : vector<16x32xf32>
    %147 = vector.broadcast %127 : vector<1x32xf32> to vector<16x32xf32>
    %148 = arith.mulf %146, %147 : vector<16x32xf32>
    %149 = vector.broadcast %128 : vector<1x32xf32> to vector<16x32xf32>
    %150 = arith.addf %148, %149 : vector<16x32xf32>
    %151 = vector.shape_cast %150 : vector<16x32xf32> to vector<2x8x32xf32>
    %c0_100 = arith.constant 0 : index
    %c0_101 = arith.constant 0 : index
    %c0_102 = arith.constant 0 : index
    %152 = vector.load %arg18[%c0_100, %c0_101, %c0_102] : memref<2x8x32xf32, #tpu.memory_space<vmem>>, vector<2x8x32xf32>
    tpu.vector_store %arg18[%c0_100, %c0_101, %c0_102], %151 {strides = array<i32>} : memref<2x8x32xf32, #tpu.memory_space<vmem>>, vector<2x8x32xf32>,
    return
  }
  func.func @transform_0(%arg0: i32) -> (i32, i32, i32) {
    %c0_i32 = arith.constant 0 : i32
    %c0_i32_0 = arith.constant 0 : i32
    %c0_i32_1 = arith.constant 0 : i32
    return %arg0, %c0_i32, %c0_i32_0 : i32, i32, i32
  }
  func.func @transform_1(%arg0: i32) -> (i32, i32, i32) {
    %c0_i32 = arith.constant 0 : i32
    %c0_i32_0 = arith.constant 0 : i32
    %c0_i32_1 = arith.constant 0 : i32
    return %arg0, %c0_i32, %c0_i32_0 : i32, i32, i32
  }
  func.func @transform_2(%arg0: i32) -> (i32, i32, i32) {
    %c0_i32 = arith.constant 0 : i32
    %c0_i32_0 = arith.constant 0 : i32
    %c0_i32_1 = arith.constant 0 : i32
    return %arg0, %c0_i32, %c0_i32_0 : i32, i32, i32
  }
  func.func @transform_3(%arg0: i32) -> (i32, i32) {
    %c0_i32 = arith.constant 0 : i32
    %c0_i32_0 = arith.constant 0 : i32
    %c0_i32_1 = arith.constant 0 : i32
    return %c0_i32, %c0_i32_0 : i32, i32
  }
  func.func @transform_4(%arg0: i32) -> (i32, i32) {
    %c0_i32 = arith.constant 0 : i32
    %c0_i32_0 = arith.constant 0 : i32
    %c0_i32_1 = arith.constant 0 : i32
    return %c0_i32, %c0_i32_0 : i32, i32
  }
  func.func @transform_5(%arg0: i32) -> (i32, i32) {
    %c0_i32 = arith.constant 0 : i32
    %c0_i32_0 = arith.constant 0 : i32
    %c0_i32_1 = arith.constant 0 : i32
    return %c0_i32, %c0_i32_0 : i32, i32
  }
  func.func @transform_6(%arg0: i32) -> (i32, i32) {
    %c0_i32 = arith.constant 0 : i32
    %c0_i32_0 = arith.constant 0 : i32
    %c0_i32_1 = arith.constant 0 : i32
    return %c0_i32, %c0_i32_0 : i32, i32
  }
  func.func @transform_7(%arg0: i32) -> (i32, i32) {
    %c0_i32 = arith.constant 0 : i32
    %c0_i32_0 = arith.constant 0 : i32
    %c0_i32_1 = arith.constant 0 : i32
    return %c0_i32, %c0_i32_0 : i32, i32
  }
  func.func @transform_8(%arg0: i32) -> (i32, i32) {
    %c0_i32 = arith.constant 0 : i32
    %c0_i32_0 = arith.constant 0 : i32
    %c0_i32_1 = arith.constant 0 : i32
    return %c0_i32, %c0_i32_0 : i32, i32
  }
  func.func @transform_9(%arg0: i32) -> (i32, i32) {
    %c0_i32 = arith.constant 0 : i32
    %c0_i32_0 = arith.constant 0 : i32
    %c0_i32_1 = arith.constant 0 : i32
    return %c0_i32, %c0_i32_0 : i32, i32
  }
  func.func @transform_10(%arg0: i32) -> (i32, i32) {
    %c0_i32 = arith.constant 0 : i32
    %c0_i32_0 = arith.constant 0 : i32
    %c0_i32_1 = arith.constant 0 : i32
    return %c0_i32, %c0_i32_0 : i32, i32
  }
  func.func @transform_11(%arg0: i32) -> (i32, i32) {
    %c0_i32 = arith.constant 0 : i32
    %c0_i32_0 = arith.constant 0 : i32
    %c0_i32_1 = arith.constant 0 : i32
    return %c0_i32, %c0_i32_0 : i32, i32
  }
  func.func @transform_12(%arg0: i32) -> (i32, i32) {
    %c0_i32 = arith.constant 0 : i32
    %c0_i32_0 = arith.constant 0 : i32
    %c0_i32_1 = arith.constant 0 : i32
    return %c0_i32, %c0_i32_0 : i32, i32
  }
  func.func @transform_13(%arg0: i32) -> (i32, i32) {
    %c0_i32 = arith.constant 0 : i32
    %c0_i32_0 = arith.constant 0 : i32
    %c0_i32_1 = arith.constant 0 : i32
    return %c0_i32, %c0_i32_0 : i32, i32
  }
  func.func @transform_14(%arg0: i32) -> (i32, i32) {
    %c0_i32 = arith.constant 0 : i32
    %c0_i32_0 = arith.constant 0 : i32
    %c0_i32_1 = arith.constant 0 : i32
    return %c0_i32, %c0_i32_0 : i32, i32
  }
  func.func @transform_15(%arg0: i32) -> (i32, i32) {
    %c0_i32 = arith.constant 0 : i32
    %c0_i32_0 = arith.constant 0 : i32
    %c0_i32_1 = arith.constant 0 : i32
    return %c0_i32, %c0_i32_0 : i32, i32
  }
  func.func @transform_16(%arg0: i32) -> (i32, i32) {
    %c0_i32 = arith.constant 0 : i32
    %c0_i32_0 = arith.constant 0 : i32
    %c0_i32_1 = arith.constant 0 : i32
    return %c0_i32, %c0_i32_0 : i32, i32
  }
  func.func @transform_17(%arg0: i32) -> (i32, i32, i32) {
    %c0_i32 = arith.constant 0 : i32
    %c0_i32_0 = arith.constant 0 : i32
    %c0_i32_1 = arith.constant 0 : i32
    return %arg0, %c0_i32, %c0_i32_0 : i32, i32, i32
  }
}

module attributes {stable_mosaic.version = 11 : i64} {
  func.func @kernel(%arg0: i32, %arg1: memref<2x8x32xf32, #tpu.memory_space<vmem>>, %arg2: memref<2x8x32xf32, #tpu.memory_space<vmem>>, %arg3: memref<2x8x32xf32, #tpu.memory_space<vmem>>, %arg4: memref<32x32xf32, #tpu.memory_space<vmem>>, %arg5: memref<1x32xf32, #tpu.memory_space<vmem>>, %arg6: memref<32x32xf32, #tpu.memory_space<vmem>>, %arg7: memref<1x32xf32, #tpu.memory_space<vmem>>, %arg8: memref<32x32xf32, #tpu.memory_space<vmem>>, %arg9: memref<1x32xf32, #tpu.memory_space<vmem>>, %arg10: memref<1x32xf32, #tpu.memory_space<vmem>>, %arg11: memref<1x32xf32, #tpu.memory_space<vmem>>, %arg12: memref<32x64xf32, #tpu.memory_space<vmem>>, %arg13: memref<1x64xf32, #tpu.memory_space<vmem>>, %arg14: memref<64x32xf32, #tpu.memory_space<vmem>>, %arg15: memref<1x32xf32, #tpu.memory_space<vmem>>, %arg16: memref<1x32xf32, #tpu.memory_space<vmem>>, %arg17: memref<1x32xf32, #tpu.memory_space<vmem>>, %arg18: memref<2x8x32xf32, #tpu.memory_space<vmem>>, %arg19: memref<2x8x32xf32, #tpu.memory_space<vmem>>, %arg20: memref<2x8x32xf32, #tpu.memory_space<vmem>>, %arg21: memref<2x8x32xf32, #tpu.memory_space<vmem>>, %arg22: memref<2x8x32xf32, #tpu.memory_space<vmem>>) attributes {dimension_semantics = [#tpu.dimension_semantics<parallel>], iteration_bounds = array<i64: 1>, scalar_prefetch = 0 : i64, scratch_operands = 4 : i64, tpu.core_type = #tpu.core_type<tc>, window_params = [{transform_indices = @transform_0, window_bounds = array<i64: 2, 8, 32>}, {transform_indices = @transform_1, window_bounds = array<i64: 2, 8, 32>}, {transform_indices = @transform_2, window_bounds = array<i64: 2, 8, 32>}, {pipeline_mode = #tpu.pipeline_mode<synchronous>, transform_indices = @transform_3, window_bounds = array<i64: 32, 32>}, {pipeline_mode = #tpu.pipeline_mode<synchronous>, transform_indices = @transform_4, window_bounds = array<i64: 1, 32>}, {pipeline_mode = #tpu.pipeline_mode<synchronous>, transform_indices = @transform_5, window_bounds = array<i64: 32, 32>}, {pipeline_mode = #tpu.pipeline_mode<synchronous>, transform_indices = @transform_6, window_bounds = array<i64: 1, 32>}, {pipeline_mode = #tpu.pipeline_mode<synchronous>, transform_indices = @transform_7, window_bounds = array<i64: 32, 32>}, {pipeline_mode = #tpu.pipeline_mode<synchronous>, transform_indices = @transform_8, window_bounds = array<i64: 1, 32>}, {pipeline_mode = #tpu.pipeline_mode<synchronous>, transform_indices = @transform_9, window_bounds = array<i64: 1, 32>}, {pipeline_mode = #tpu.pipeline_mode<synchronous>, transform_indices = @transform_10, window_bounds = array<i64: 1, 32>}, {pipeline_mode = #tpu.pipeline_mode<synchronous>, transform_indices = @transform_11, window_bounds = array<i64: 32, 64>}, {pipeline_mode = #tpu.pipeline_mode<synchronous>, transform_indices = @transform_12, window_bounds = array<i64: 1, 64>}, {pipeline_mode = #tpu.pipeline_mode<synchronous>, transform_indices = @transform_13, window_bounds = array<i64: 64, 32>}, {pipeline_mode = #tpu.pipeline_mode<synchronous>, transform_indices = @transform_14, window_bounds = array<i64: 1, 32>}, {pipeline_mode = #tpu.pipeline_mode<synchronous>, transform_indices = @transform_15, window_bounds = array<i64: 1, 32>}, {pipeline_mode = #tpu.pipeline_mode<synchronous>, transform_indices = @transform_16, window_bounds = array<i64: 1, 32>}, {transform_indices = @transform_17, window_bounds = array<i64: 2, 8, 32>}]} {
    %c0 = arith.constant 0 : index
    %c0_0 = arith.constant 0 : index
    %c0_1 = arith.constant 0 : index
    %0 = vector.load %arg1[%c0, %c0_0, %c0_1] : memref<2x8x32xf32, #tpu.memory_space<vmem>>, vector<2x8x32xf32>
    %1 = vector.shape_cast %0 : vector<2x8x32xf32> to vector<16x32xf32>
    %c0_2 = arith.constant 0 : index
    %c0_3 = arith.constant 0 : index
    %c0_4 = arith.constant 0 : index
    %2 = vector.load %arg2[%c0_2, %c0_3, %c0_4] : memref<2x8x32xf32, #tpu.memory_space<vmem>>, vector<2x8x32xf32>
    %3 = vector.shape_cast %2 : vector<2x8x32xf32> to vector<16x32xf32>
    %c0_5 = arith.constant 0 : index
    %c0_6 = arith.constant 0 : index
    %c0_7 = arith.constant 0 : index
    %4 = vector.load %arg3[%c0_5, %c0_6, %c0_7] : memref<2x8x32xf32, #tpu.memory_space<vmem>>, vector<2x8x32xf32>
    %5 = vector.shape_cast %4 : vector<2x8x32xf32> to vector<16x32xf32>
    %6 = tpu.concatenate %1, %3 in 0 : vector<16x32xf32>, vector<16x32xf32> -> vector<32x32xf32>
    %c0_8 = arith.constant 0 : index
    %c0_9 = arith.constant 0 : index
    %7 = vector.load %arg4[%c0_8, %c0_9] : memref<32x32xf32, #tpu.memory_space<vmem>>, vector<32x32xf32>
    %cst = arith.constant dense<0.000000e+00> : vector<32x32xf32>
    %8 = tpu.matmul %6, %7, %cst {dimension_numbers = #tpu.dot_dimension_numbers<[1], [0], [0], [1], [0, 0, 1, 1], [], []>} : vector<32x32xf32>, vector<32x32xf32>, vector<32x32xf32> -> vector<32x32xf32>
    %c0_10 = arith.constant 0 : index
    %c0_11 = arith.constant 0 : index
    %9 = vector.load %arg5[%c0_10, %c0_11] : memref<1x32xf32, #tpu.memory_space<vmem>>, vector<1x32xf32>
    %10 = vector.broadcast %9 : vector<1x32xf32> to vector<32x32xf32>
    %11 = arith.addf %8, %10 : vector<32x32xf32>
    %12 = vector.extract_strided_slice %11 {offsets = [0, 0], sizes = [16, 32], strides = [1, 1]} : vector<32x32xf32> to vector<16x32xf32>
    %13 = vector.extract_strided_slice %11 {offsets = [16, 0], sizes = [16, 32], strides = [1, 1]} : vector<32x32xf32> to vector<16x32xf32>
    %c0_12 = arith.constant 0 : index
    %c0_13 = arith.constant 0 : index
    %14 = vector.load %arg6[%c0_12, %c0_13] : memref<32x32xf32, #tpu.memory_space<vmem>>, vector<32x32xf32>
    %cst_14 = arith.constant dense<0.000000e+00> : vector<16x32xf32>
    %15 = tpu.matmul %5, %14, %cst_14 {dimension_numbers = #tpu.dot_dimension_numbers<[1], [0], [0], [1], [0, 0, 1, 1], [], []>} : vector<16x32xf32>, vector<32x32xf32>, vector<16x32xf32> -> vector<16x32xf32>
    %c0_15 = arith.constant 0 : index
    %c0_16 = arith.constant 0 : index
    %16 = vector.load %arg7[%c0_15, %c0_16] : memref<1x32xf32, #tpu.memory_space<vmem>>, vector<1x32xf32>
    %17 = vector.broadcast %16 : vector<1x32xf32> to vector<16x32xf32>
    %18 = arith.addf %15, %17 : vector<16x32xf32>
    %cst_17 = arith.constant 2.500000e-01 : f32
    %19 = vector.broadcast %cst_17 : f32 to vector<16x32xf32>
    %20 = arith.mulf %12, %19 : vector<16x32xf32>
    %21 = vector.shape_cast %20 : vector<16x32xf32> to vector<2x8x32xf32>
    %c0_18 = arith.constant 0 : index
    %c0_19 = arith.constant 0 : index
    %c0_20 = arith.constant 0 : index
    %22 = vector.load %arg19[%c0_18, %c0_19, %c0_20] : memref<2x8x32xf32, #tpu.memory_space<vmem>>, vector<2x8x32xf32>
    tpu.vector_store %arg19[%c0_18, %c0_19, %c0_20], %21 {strides = array<i32>} : memref<2x8x32xf32, #tpu.memory_space<vmem>>, vector<2x8x32xf32>,
    %23 = vector.shape_cast %13 : vector<16x32xf32> to vector<2x8x32xf32>
    %c0_21 = arith.constant 0 : index
    %c0_22 = arith.constant 0 : index
    %c0_23 = arith.constant 0 : index
    %24 = vector.load %arg20[%c0_21, %c0_22, %c0_23] : memref<2x8x32xf32, #tpu.memory_space<vmem>>, vector<2x8x32xf32>
    tpu.vector_store %arg20[%c0_21, %c0_22, %c0_23], %23 {strides = array<i32>} : memref<2x8x32xf32, #tpu.memory_space<vmem>>, vector<2x8x32xf32>,
    %25 = vector.shape_cast %18 : vector<16x32xf32> to vector<2x8x32xf32>
    %c0_24 = arith.constant 0 : index
    %c0_25 = arith.constant 0 : index
    %c0_26 = arith.constant 0 : index
    %26 = vector.load %arg21[%c0_24, %c0_25, %c0_26] : memref<2x8x32xf32, #tpu.memory_space<vmem>>, vector<2x8x32xf32>
    tpu.vector_store %arg21[%c0_24, %c0_25, %c0_26], %25 {strides = array<i32>} : memref<2x8x32xf32, #tpu.memory_space<vmem>>, vector<2x8x32xf32>,
    %27 = tpu.iota {dimensions = array<i32: 0>} : vector<8x8xi32>
    %28 = tpu.iota {dimensions = array<i32: 1>} : vector<8x8xi32>
    %c0_i32 = arith.constant 0 : i32
    %29 = vector.broadcast %c0_i32 : i32 to vector<8x8xi32>
    %30 = arith.addi %27, %29 : vector<8x8xi32>
    %31 = arith.cmpi slt, %28, %30 : vector<8x8xi32>
    %32 = vector.shape_cast %31 : vector<8x8xi1> to vector<1x8x8xi1>
    %c0_i32_27 = arith.constant 0 : i32
    %33 = vector.broadcast %c0_i32_27 : i32 to vector<8x8xi32>
    %34 = arith.cmpi eq, %27, %33 : vector<8x8xi32>
    %35 = vector.shape_cast %34 : vector<8x8xi1> to vector<1x8x8xi1>
    %c0_28 = arith.constant 0 : index
    %c0_29 = arith.constant 0 : index
    %c0_30 = arith.constant 0 : index
    %36 = vector.load %arg19[%c0_28, %c0_29, %c0_30] : memref<2x8x32xf32, #tpu.memory_space<vmem>>, vector<2x8x16xf32>
    %c0_31 = arith.constant 0 : index
    %c0_32 = arith.constant 0 : index
    %c0_33 = arith.constant 0 : index
    %37 = vector.load %arg20[%c0_31, %c0_32, %c0_33] : memref<2x8x32xf32, #tpu.memory_space<vmem>>, vector<2x8x16xf32>
    %c0_34 = arith.constant 0 : index
    %c0_35 = arith.constant 0 : index
    %c0_36 = arith.constant 0 : index
    %38 = vector.load %arg21[%c0_34, %c0_35, %c0_36] : memref<2x8x32xf32, #tpu.memory_space<vmem>>, vector<2x8x16xf32>
    "tpu.trace_start"() <{level = 10 : i32, message = "bqd,bkd->bqk"}> : () -> ()
    %cst_37 = arith.constant dense<0.000000e+00> : vector<2x8x8xf32>
    %39 = tpu.matmul %36, %37, %cst_37 {dimension_numbers = #tpu.dot_dimension_numbers<[2], [2], [1], [1], [0, 0, 0, 1, 1, 1], [0], [0]>} : vector<2x8x16xf32>, vector<2x8x16xf32>, vector<2x8x8xf32> -> vector<2x8x8xf32>
    %cst_38 = arith.constant -1.000000e+32 : f32
    "tpu.trace_stop"() : () -> ()
    %40 = vector.shape_cast %32 : vector<1x8x8xi1> to vector<1x8x8xi1>
    %41 = vector.broadcast %40 : vector<1x8x8xi1> to vector<2x8x8xi1>
    %42 = vector.broadcast %cst_38 : f32 to vector<2x8x8xf32>
    %43 = arith.select %41, %39, %42 : vector<2x8x8xi1>, vector<2x8x8xf32>
    %cst_39 = arith.constant dense<0xFF800000> : vector<2x8xf32>
    %44 = vector.multi_reduction <maximumf>, %43, %cst_39 [2] : vector<2x8x8xf32> to vector<2x8xf32>
    %45 = vector.shape_cast %44 : vector<2x8xf32> to vector<2x8x1xf32>
    %46 = vector.broadcast %45 : vector<2x8x1xf32> to vector<2x8x8xf32>
    %47 = arith.subf %43, %46 : vector<2x8x8xf32>
    %48 = math.exp %47 : vector<2x8x8xf32>
    %cst_40 = arith.constant dense<0.000000e+00> : vector<2x8xf32>
    %49 = vector.multi_reduction <add>, %48, %cst_40 [2] : vector<2x8x8xf32> to vector<2x8xf32>
    %50 = vector.shape_cast %49 : vector<2x8xf32> to vector<2x8x1xf32>
    %cst_41 = arith.constant 0.000000e+00 : f32
    %51 = vector.shape_cast %35 : vector<1x8x8xi1> to vector<1x8x8xi1>
    %52 = vector.broadcast %51 : vector<1x8x8xi1> to vector<2x8x8xi1>
    %53 = vector.broadcast %cst_41 : f32 to vector<2x8x8xf32>
    %54 = arith.select %52, %53, %48 : vector<2x8x8xi1>, vector<2x8x8xf32>
    "tpu.trace_start"() <{level = 10 : i32, message = "bqk,bkd->bqd"}> : () -> ()
    %cst_42 = arith.constant dense<0.000000e+00> : vector<2x8x16xf32>
    %55 = tpu.matmul %54, %38, %cst_42 {dimension_numbers = #tpu.dot_dimension_numbers<[2], [1], [1], [2], [0, 0, 0, 1, 1, 2], [0], [0]>} : vector<2x8x8xf32>, vector<2x8x16xf32>, vector<2x8x16xf32> -> vector<2x8x16xf32>
    "tpu.trace_stop"() : () -> ()
    %56 = vector.broadcast %50 : vector<2x8x1xf32> to vector<2x8x16xf32>
    %57 = arith.divf %55, %56 : vector<2x8x16xf32>
    %c0_43 = arith.constant 0 : index
    %c0_44 = arith.constant 0 : index
    %c0_45 = arith.constant 0 : index
    %58 = vector.load %arg22[%c0_43, %c0_44, %c0_45] : memref<2x8x32xf32, #tpu.memory_space<vmem>>, vector<2x8x16xf32>
    tpu.vector_store %arg22[%c0_43, %c0_44, %c0_45], %57 {strides = array<i32>} : memref<2x8x32xf32, #tpu.memory_space<vmem>>, vector<2x8x16xf32>,
    %c0_46 = arith.constant 0 : index
    %c0_47 = arith.constant 0 : index
    %c16 = arith.constant 16 : index
    %59 = vector.load %arg19[%c0_46, %c0_47, %c16] : memref<2x8x32xf32, #tpu.memory_space<vmem>>, vector<2x8x16xf32>
    %c0_48 = arith.constant 0 : index
    %c0_49 = arith.constant 0 : index
    %c16_50 = arith.constant 16 : index
    %60 = vector.load %arg20[%c0_48, %c0_49, %c16_50] : memref<2x8x32xf32, #tpu.memory_space<vmem>>, vector<2x8x16xf32>
    %c0_51 = arith.constant 0 : index
    %c0_52 = arith.constant 0 : index
    %c16_53 = arith.constant 16 : index
    %61 = vector.load %arg21[%c0_51, %c0_52, %c16_53] : memref<2x8x32xf32, #tpu.memory_space<vmem>>, vector<2x8x16xf32>
    "tpu.trace_start"() <{level = 10 : i32, message = "bqd,bkd->bqk"}> : () -> ()
    %cst_54 = arith.constant dense<0.000000e+00> : vector<2x8x8xf32>
    %62 = tpu.matmul %59, %60, %cst_54 {dimension_numbers = #tpu.dot_dimension_numbers<[2], [2], [1], [1], [0, 0, 0, 1, 1, 1], [0], [0]>} : vector<2x8x16xf32>, vector<2x8x16xf32>, vector<2x8x8xf32> -> vector<2x8x8xf32>
    %cst_55 = arith.constant -1.000000e+32 : f32
    "tpu.trace_stop"() : () -> ()
    %63 = vector.shape_cast %32 : vector<1x8x8xi1> to vector<1x8x8xi1>
    %64 = vector.broadcast %63 : vector<1x8x8xi1> to vector<2x8x8xi1>
    %65 = vector.broadcast %cst_55 : f32 to vector<2x8x8xf32>
    %66 = arith.select %64, %62, %65 : vector<2x8x8xi1>, vector<2x8x8xf32>
    %cst_56 = arith.constant dense<0xFF800000> : vector<2x8xf32>
    %67 = vector.multi_reduction <maximumf>, %66, %cst_56 [2] : vector<2x8x8xf32> to vector<2x8xf32>
    %68 = vector.shape_cast %67 : vector<2x8xf32> to vector<2x8x1xf32>
    %69 = vector.broadcast %68 : vector<2x8x1xf32> to vector<2x8x8xf32>
    %70 = arith.subf %66, %69 : vector<2x8x8xf32>
    %71 = math.exp %70 : vector<2x8x8xf32>
    %cst_57 = arith.constant dense<0.000000e+00> : vector<2x8xf32>
    %72 = vector.multi_reduction <add>, %71, %cst_57 [2] : vector<2x8x8xf32> to vector<2x8xf32>
    %73 = vector.shape_cast %72 : vector<2x8xf32> to vector<2x8x1xf32>
    %cst_58 = arith.constant 0.000000e+00 : f32
    %74 = vector.shape_cast %35 : vector<1x8x8xi1> to vector<1x8x8xi1>
    %75 = vector.broadcast %74 : vector<1x8x8xi1> to vector<2x8x8xi1>
    %76 = vector.broadcast %cst_58 : f32 to vector<2x8x8xf32>
    %77 = arith.select %75, %76, %71 : vector<2x8x8xi1>, vector<2x8x8xf32>
    "tpu.trace_start"() <{level = 10 : i32, message = "bqk,bkd->bqd"}> : () -> ()
    %cst_59 = arith.constant dense<0.000000e+00> : vector<2x8x16xf32>
    %78 = tpu.matmul %77, %61, %cst_59 {dimension_numbers = #tpu.dot_dimension_numbers<[2], [1], [1], [2], [0, 0, 0, 1, 1, 2], [0], [0]>} : vector<2x8x8xf32>, vector<2x8x16xf32>, vector<2x8x16xf32> -> vector<2x8x16xf32>
    "tpu.trace_stop"() : () -> ()
    %79 = vector.broadcast %73 : vector<2x8x1xf32> to vector<2x8x16xf32>
    %80 = arith.divf %78, %79 : vector<2x8x16xf32>
    %c0_60 = arith.constant 0 : index
    %c0_61 = arith.constant 0 : index
    %c16_62 = arith.constant 16 : index
    %81 = vector.load %arg22[%c0_60, %c0_61, %c16_62] : memref<2x8x32xf32, #tpu.memory_space<vmem>>, vector<2x8x16xf32>
    tpu.vector_store %arg22[%c0_60, %c0_61, %c16_62], %80 {strides = array<i32>} : memref<2x8x32xf32, #tpu.memory_space<vmem>>, vector<2x8x16xf32>,
    %c0_63 = arith.constant 0 : index
    %c0_64 = arith.constant 0 : index
    %c0_65 = arith.constant 0 : index
    %82 = vector.load %arg22[%c0_63, %c0_64, %c0_65] : memref<2x8x32xf32, #tpu.memory_space<vmem>>, vector<2x8x32xf32>
    %83 = vector.shape_cast %82 : vector<2x8x32xf32> to vector<16x32xf32>
    %c0_66 = arith.constant 0 : index
    %c0_67 = arith.constant 0 : index
    %84 = vector.load %arg8[%c0_66, %c0_67] : memref<32x32xf32, #tpu.memory_space<vmem>>, vector<32x32xf32>
    %cst_68 = arith.constant dense<0.000000e+00> : vector<16x32xf32>
    %85 = tpu.matmul %83, %84, %cst_68 {dimension_numbers = #tpu.dot_dimension_numbers<[1], [0], [0], [1], [0, 0, 1, 1], [], []>} : vector<16x32xf32>, vector<32x32xf32>, vector<16x32xf32> -> vector<16x32xf32>
    %86 = arith.addf %1, %85 : vector<16x32xf32>
    %c0_69 = arith.constant 0 : index
    %c0_70 = arith.constant 0 : index
    %87 = vector.load %arg9[%c0_69, %c0_70] : memref<1x32xf32, #tpu.memory_space<vmem>>, vector<1x32xf32>
    %88 = vector.broadcast %87 : vector<1x32xf32> to vector<16x32xf32>
    %89 = arith.addf %86, %88 : vector<16x32xf32>
    %c0_71 = arith.constant 0 : index
    %c0_72 = arith.constant 0 : index
    %90 = vector.load %arg10[%c0_71, %c0_72] : memref<1x32xf32, #tpu.memory_space<vmem>>, vector<1x32xf32>
    %c0_73 = arith.constant 0 : index
    %c0_74 = arith.constant 0 : index
    %91 = vector.load %arg11[%c0_73, %c0_74] : memref<1x32xf32, #tpu.memory_space<vmem>>, vector<1x32xf32>
    %cst_75 = arith.constant dense<0.000000e+00> : vector<16xf32>
    %92 = vector.multi_reduction <add>, %89, %cst_75 [1] : vector<16x32xf32> to vector<16xf32>
    %93 = vector.shape_cast %92 : vector<16xf32> to vector<16x1xf32>
    %cst_76 = arith.constant 3.200000e+01 : f32
    %94 = vector.broadcast %cst_76 : f32 to vector<16x1xf32>
    %95 = arith.divf %93, %94 : vector<16x1xf32>
    %96 = vector.broadcast %95 : vector<16x1xf32> to vector<16x32xf32>
    %97 = arith.subf %89, %96 : vector<16x32xf32>
    %98 = arith.mulf %97, %97 : vector<16x32xf32>
    %cst_77 = arith.constant dense<0.000000e+00> : vector<16xf32>
    %99 = vector.multi_reduction <add>, %98, %cst_77 [1] : vector<16x32xf32> to vector<16xf32>
    %100 = vector.shape_cast %99 : vector<16xf32> to vector<16x1xf32>
    %cst_78 = arith.constant 3.200000e+01 : f32
    %101 = vector.broadcast %cst_78 : f32 to vector<16x1xf32>
    %102 = arith.divf %100, %101 : vector<16x1xf32>
    %103 = vector.broadcast %95 : vector<16x1xf32> to vector<16x32xf32>
    %104 = arith.subf %89, %103 : vector<16x32xf32>
    %cst_79 = arith.constant 9.99999974E-6 : f32
    %105 = vector.broadcast %cst_79 : f32 to vector<16x1xf32>
    %106 = arith.addf %102, %105 : vector<16x1xf32>
    %107 = math.rsqrt %106 : vector<16x1xf32>
    %108 = vector.broadcast %107 : vector<16x1xf32> to vector<16x32xf32>
    %109 = arith.mulf %104, %108 : vector<16x32xf32>
    %110 = vector.broadcast %90 : vector<1x32xf32> to vector<16x32xf32>
    %111 = arith.mulf %109, %110 : vector<16x32xf32>
    %112 = vector.broadcast %91 : vector<1x32xf32> to vector<16x32xf32>
    %113 = arith.addf %111, %112 : vector<16x32xf32>
    %c0_80 = arith.constant 0 : index
    %c0_81 = arith.constant 0 : index
    %114 = vector.load %arg12[%c0_80, %c0_81] : memref<32x64xf32, #tpu.memory_space<vmem>>, vector<32x64xf32>
    %cst_82 = arith.constant dense<0.000000e+00> : vector<16x64xf32>
    %115 = tpu.matmul %113, %114, %cst_82 {dimension_numbers = #tpu.dot_dimension_numbers<[1], [0], [0], [1], [0, 0, 1, 1], [], []>} : vector<16x32xf32>, vector<32x64xf32>, vector<16x64xf32> -> vector<16x64xf32>
    %c0_83 = arith.constant 0 : index
    %c0_84 = arith.constant 0 : index
    %116 = vector.load %arg13[%c0_83, %c0_84] : memref<1x64xf32, #tpu.memory_space<vmem>>, vector<1x64xf32>
    %117 = vector.broadcast %116 : vector<1x64xf32> to vector<16x64xf32>
    %118 = arith.addf %115, %117 : vector<16x64xf32>
    %cst_85 = arith.constant 0.000000e+00 : f32
    %119 = vector.broadcast %cst_85 : f32 to vector<16x64xf32>
    %120 = arith.maximumf %118, %119 : vector<16x64xf32>
    %c0_86 = arith.constant 0 : index
    %c0_87 = arith.constant 0 : index
    %121 = vector.load %arg14[%c0_86, %c0_87] : memref<64x32xf32, #tpu.memory_space<vmem>>, vector<64x32xf32>
    %cst_88 = arith.constant dense<0.000000e+00> : vector<16x32xf32>
    %122 = tpu.matmul %120, %121, %cst_88 {dimension_numbers = #tpu.dot_dimension_numbers<[1], [0], [0], [1], [0, 0, 1, 1], [], []>} : vector<16x64xf32>, vector<64x32xf32>, vector<16x32xf32> -> vector<16x32xf32>
    %c0_89 = arith.constant 0 : index
    %c0_90 = arith.constant 0 : index
    %123 = vector.load %arg15[%c0_89, %c0_90] : memref<1x32xf32, #tpu.memory_space<vmem>>, vector<1x32xf32>
    %124 = vector.broadcast %123 : vector<1x32xf32> to vector<16x32xf32>
    %125 = arith.addf %122, %124 : vector<16x32xf32>
    %126 = arith.addf %113, %125 : vector<16x32xf32>
    %c0_91 = arith.constant 0 : index
    %c0_92 = arith.constant 0 : index
    %127 = vector.load %arg16[%c0_91, %c0_92] : memref<1x32xf32, #tpu.memory_space<vmem>>, vector<1x32xf32>
    %c0_93 = arith.constant 0 : index
    %c0_94 = arith.constant 0 : index
    %128 = vector.load %arg17[%c0_93, %c0_94] : memref<1x32xf32, #tpu.memory_space<vmem>>, vector<1x32xf32>
    %cst_95 = arith.constant dense<0.000000e+00> : vector<16xf32>
    %129 = vector.multi_reduction <add>, %126, %cst_95 [1] : vector<16x32xf32> to vector<16xf32>
    %130 = vector.shape_cast %129 : vector<16xf32> to vector<16x1xf32>
    %cst_96 = arith.constant 3.200000e+01 : f32
    %131 = vector.broadcast %cst_96 : f32 to vector<16x1xf32>
    %132 = arith.divf %130, %131 : vector<16x1xf32>
    %133 = vector.broadcast %132 : vector<16x1xf32> to vector<16x32xf32>
    %134 = arith.subf %126, %133 : vector<16x32xf32>
    %135 = arith.mulf %134, %134 : vector<16x32xf32>
    %cst_97 = arith.constant dense<0.000000e+00> : vector<16xf32>
    %136 = vector.multi_reduction <add>, %135, %cst_97 [1] : vector<16x32xf32> to vector<16xf32>
    %137 = vector.shape_cast %136 : vector<16xf32> to vector<16x1xf32>
    %cst_98 = arith.constant 3.200000e+01 : f32
    %138 = vector.broadcast %cst_98 : f32 to vector<16x1xf32>
    %139 = arith.divf %137, %138 : vector<16x1xf32>
    %140 = vector.broadcast %132 : vector<16x1xf32> to vector<16x32xf32>
    %141 = arith.subf %126, %140 : vector<16x32xf32>
    %cst_99 = arith.constant 9.99999974E-6 : f32
    %142 = vector.broadcast %cst_99 : f32 to vector<16x1xf32>
    %143 = arith.addf %139, %142 : vector<16x1xf32>
    %144 = math.rsqrt %143 : vector<16x1xf32>
    %145 = vector.broadcast %144 : vector<16x1xf32> to vector<16x32xf32>
    %146 = arith.mulf %141, %145 : vector<16x32xf32>
    %147 = vector.broadcast %127 : vector<1x32xf32> to vector<16x32xf32>
    %148 = arith.mulf %146, %147 : vector<16x32xf32>
    %149 = vector.broadcast %128 : vector<1x32xf32> to vector<16x32xf32>
    %150 = arith.addf %148, %149 : vector<16x32xf32>
    %151 = vector.shape_cast %150 : vector<16x32xf32> to vector<2x8x32xf32>
    %c0_100 = arith.constant 0 : index
    %c0_101 = arith.constant 0 : index
    %c0_102 = arith.constant 0 : index
    %152 = vector.load %arg18[%c0_100, %c0_101, %c0_102] : memref<2x8x32xf32, #tpu.memory_space<vmem>>, vector<2x8x32xf32>
    tpu.vector_store %arg18[%c0_100, %c0_101, %c0_102], %151 {strides = array<i32>} : memref<2x8x32xf32, #tpu.memory_space<vmem>>, vector<2x8x32xf32>,
    return
  }
  func.func @transform_0(%arg0: i32) -> (i32, i32, i32) {
    %c0_i32 = arith.constant 0 : i32
    %c0_i32_0 = arith.constant 0 : i32
    %c0_i32_1 = arith.constant 0 : i32
    return %arg0, %c0_i32, %c0_i32_0 : i32, i32, i32
  }
  func.func @transform_1(%arg0: i32) -> (i32, i32, i32) {
    %c0_i32 = arith.constant 0 : i32
    %c0_i32_0 = arith.constant 0 : i32
    %c0_i32_1 = arith.constant 0 : i32
    return %arg0, %c0_i32, %c0_i32_0 : i32, i32, i32
  }
  func.func @transform_2(%arg0: i32) -> (i32, i32, i32) {
    %c0_i32 = arith.constant 0 : i32
    %c0_i32_0 = arith.constant 0 : i32
    %c0_i32_1 = arith.constant 0 : i32
    return %arg0, %c0_i32, %c0_i32_0 : i32, i32, i32
  }
  func.func @transform_3(%arg0: i32) -> (i32, i32) {
    %c0_i32 = arith.constant 0 : i32
    %c0_i32_0 = arith.constant 0 : i32
    %c0_i32_1 = arith.constant 0 : i32
    return %c0_i32, %c0_i32_0 : i32, i32
  }
  func.func @transform_4(%arg0: i32) -> (i32, i32) {
    %c0_i32 = arith.constant 0 : i32
    %c0_i32_0 = arith.constant 0 : i32
    %c0_i32_1 = arith.constant 0 : i32
    return %c0_i32, %c0_i32_0 : i32, i32
  }
  func.func @transform_5(%arg0: i32) -> (i32, i32) {
    %c0_i32 = arith.constant 0 : i32
    %c0_i32_0 = arith.constant 0 : i32
    %c0_i32_1 = arith.constant 0 : i32
    return %c0_i32, %c0_i32_0 : i32, i32
  }
  func.func @transform_6(%arg0: i32) -> (i32, i32) {
    %c0_i32 = arith.constant 0 : i32
    %c0_i32_0 = arith.constant 0 : i32
    %c0_i32_1 = arith.constant 0 : i32
    return %c0_i32, %c0_i32_0 : i32, i32
  }
  func.func @transform_7(%arg0: i32) -> (i32, i32) {
    %c0_i32 = arith.constant 0 : i32
    %c0_i32_0 = arith.constant 0 : i32
    %c0_i32_1 = arith.constant 0 : i32
    return %c0_i32, %c0_i32_0 : i32, i32
  }
  func.func @transform_8(%arg0: i32) -> (i32, i32) {
    %c0_i32 = arith.constant 0 : i32
    %c0_i32_0 = arith.constant 0 : i32
    %c0_i32_1 = arith.constant 0 : i32
    return %c0_i32, %c0_i32_0 : i32, i32
  }
  func.func @transform_9(%arg0: i32) -> (i32, i32) {
    %c0_i32 = arith.constant 0 : i32
    %c0_i32_0 = arith.constant 0 : i32
    %c0_i32_1 = arith.constant 0 : i32
    return %c0_i32, %c0_i32_0 : i32, i32
  }
  func.func @transform_10(%arg0: i32) -> (i32, i32) {
    %c0_i32 = arith.constant 0 : i32
    %c0_i32_0 = arith.constant 0 : i32
    %c0_i32_1 = arith.constant 0 : i32
    return %c0_i32, %c0_i32_0 : i32, i32
  }
  func.func @transform_11(%arg0: i32) -> (i32, i32) {
    %c0_i32 = arith.constant 0 : i32
    %c0_i32_0 = arith.constant 0 : i32
    %c0_i32_1 = arith.constant 0 : i32
    return %c0_i32, %c0_i32_0 : i32, i32
  }
  func.func @transform_12(%arg0: i32) -> (i32, i32) {
    %c0_i32 = arith.constant 0 : i32
    %c0_i32_0 = arith.constant 0 : i32
    %c0_i32_1 = arith.constant 0 : i32
    return %c0_i32, %c0_i32_0 : i32, i32
  }
  func.func @transform_13(%arg0: i32) -> (i32, i32) {
    %c0_i32 = arith.constant 0 : i32
    %c0_i32_0 = arith.constant 0 : i32
    %c0_i32_1 = arith.constant 0 : i32
    return %c0_i32, %c0_i32_0 : i32, i32
  }
  func.func @transform_14(%arg0: i32) -> (i32, i32) {
    %c0_i32 = arith.constant 0 : i32
    %c0_i32_0 = arith.constant 0 : i32
    %c0_i32_1 = arith.constant 0 : i32
    return %c0_i32, %c0_i32_0 : i32, i32
  }
  func.func @transform_15(%arg0: i32) -> (i32, i32) {
    %c0_i32 = arith.constant 0 : i32
    %c0_i32_0 = arith.constant 0 : i32
    %c0_i32_1 = arith.constant 0 : i32
    return %c0_i32, %c0_i32_0 : i32, i32
  }
  func.func @transform_16(%arg0: i32) -> (i32, i32) {
    %c0_i32 = arith.constant 0 : i32
    %c0_i32_0 = arith.constant 0 : i32
    %c0_i32_1 = arith.constant 0 : i32
    return %c0_i32, %c0_i32_0 : i32, i32
  }
  func.func @transform_17(%arg0: i32) -> (i32, i32, i32) {
    %c0_i32 = arith.constant 0 : i32
    %c0_i32_0 = arith.constant 0 : i32
    %c0_i32_1 = arith.constant 0 : i32
    return %arg0, %c0_i32, %c0_i32_0 : i32, i32, i32
  }
}

</mosaic_0001>

<bundles_post_ra>
// kernel: tpu_custom_call.1
= control target key start
LH: loop header
LB: loop body
LE: loop exit
PB: predicated region body
PF: predicated region fallthrough
CT: control target
= control target key end

     0   :  { %s2212_s0 = inlined_call_operand.hbm [shape: f32[2,8,32], index: 0, kind: input, shape index: {}]   ;;  %s2213_s1 = inlined_call_operand.hbm [shape: f32[2,8,32], index: 1, kind: input, shape index: {}]   ;;  %s2214_s2 = inlined_call_operand.hbm [shape: f32[2,8,32], index: 2, kind: input, shape index: {}]   ;;  %s2215_s3 = inlined_call_operand.vmem [shape: f32[32,32], index: 3, kind: input, shape index: {}]   ;;  %s2216_s4 = inlined_call_operand.vmem [shape: f32[1,32], index: 4, kind: input, shape index: {}]   ;;  %s2217_s5 = inlined_call_operand.vmem [shape: f32[32,32], index: 5, kind: input, shape index: {}]   ;;  %s2218_s6 = inlined_call_operand.vmem [shape: f32[1,32], index: 6, kind: input, shape index: {}]   ;;  %s2219_s7 = inlined_call_operand.vmem [shape: f32[32,32], index: 7, kind: input, shape index: {}]   ;;  %s2220_s8 = inlined_call_operand.vmem [shape: f32[1,32], index: 8, kind: input, shape index: {}]   ;;  %s2221_s9 = inlined_call_operand.vmem [shape: f32[1,32], index: 9, kind: input, shape index: {}]   ;;  %s2222_s10 = inlined_call_operand.vmem [shape: f32[1,32], index: 10, kind: input, shape index: {}]   ;;  %s2223_s11 = inlined_call_operand.hbm [shape: f32[32,64], index: 11, kind: input, shape index: {}]   ;;  %s2224_s12 = inlined_call_operand.vmem [shape: f32[1,64], index: 12, kind: input, shape index: {}]   ;;  %s2225_s13 = inlined_call_operand.vmem [shape: f32[64,32], index: 13, kind: input, shape index: {}]   ;;  %s2226_s14 = inlined_call_operand.vmem [shape: f32[1,32], index: 14, kind: input, shape index: {}]   ;;  %s2227_s15 = inlined_call_operand.vmem [shape: f32[1,32], index: 15, kind: input, shape index: {}]   ;;  %s2228_s16 = inlined_call_operand.vmem [shape: f32[1,32], index: 16, kind: input, shape index: {}]   ;;  %s2229_s17 = inlined_call_operand.hbm [shape: f32[2,8,32], index: 17, kind: output, shape index: {}]  }
   0x1   :  { %2233 = sst [smem:[#allocation19_spill]] %s2212_s0 }
   0x2   :  { %2234 = sst [smem:[#allocation20_spill]] %s2213_s1 }
   0x3   :  { %2235 = sst [smem:[#allocation21_spill]] %s2228_s16 }
   0x4   :  { %2236 = sst [smem:[#allocation22_spill]] %s2229_s17 }
   0x5   :  { %22 = vsyncpa [#allocation7], 0 }
   0x6   :  { %23 = vsyncpa [#allocation10], 0 }
   0x7   :  { %24 = vsyncpa [#allocation13], 0 }
   0x8   :  { %25 = vsyncpa [#allocation8], 0  ;;  %s1821_s24 = smov [#allocation9]   ;;  %s1822_s26 = smov [#allocation6]  }
   0x9   :  { %s43_s25 = sshll.u32 %s1821_s24, 4  ;;  %s31_s27 = sshll.u32 %s1822_s26, 4  ;;  %s44_s25 = int_to_ptr.vmem [resolvable:$true] %s43_s25  ;;  %s1922_s27 = int_to_ptr.vmem [resolvable:$true] %s31_s27 }
   0xa   :  { %s2237_s0 = sld [smem:[#allocation20_spill]] }
  0x10   :  { %s1703_s30 = scalar_lea.hbm %s2237_s0, 256 }
  0x11   :  { %p1704_p0 = scmp.ne.s32.totalorder %s2237_s0, %s1703_s30  ;;  %p1707_p1 = scmp.lt.u32.totalorder %s1703_s30, %s2237_s0 }
  0x13   :  { %p1709_p2 = pnand %p1707_p1, %p1704_p0 }
  0x15   :  { %1712 = shalt.err (!%p1709_p2)
}
  0x16   :  { %s1713_s21 = scalar_lea.vmem %s44_s25, 256  ;;  %p1718_p4 = scmp.lt.s32.totalorder %s44_s25, %s44_s25 }
  0x17   :  { %p1714_p3 = scmp.ne.s32.totalorder %s44_s25, %s1713_s21  ;;  %p1719_p5 = scmp.lt.s32.totalorder %s1713_s21, %s1713_s21 }
  0x19   :  { %p1720_p6 = por %p1719_p5, %p1718_p4 }
  0x1b   :  { %p1721_p7 = pnand %p1720_p6, %p1714_p3 }
  0x1d   :  { %1724 = shalt.err (!%p1721_p7)
}
  0x1e   :  { %s1823_s22 = smov 128   ;;  %s1824_s23 = smov 8  }
  0x1f   :  { %49 = dma.hbm_to_vmem [thread:$0]  %s2237_s0, 256, %s44_s25, [#allocation10], %s1823_s22, %s1823_s22, %s1824_s23  }
  0x20   :  { %s2238_s30 = sld [smem:[#allocation19_spill]] }
  0x26   :  { %s1725_s18 = scalar_lea.hbm %s2238_s30, 256 }
  0x27   :  { %p1726_p8 = scmp.ne.s32.totalorder %s2238_s30, %s1725_s18  ;;  %p1729_p9 = scmp.lt.u32.totalorder %s1725_s18, %s2238_s30 }
  0x29   :  { %p1731_p10 = pnand %p1729_p9, %p1726_p8 }
  0x2b   :  { %1734 = shalt.err (!%p1731_p10)
}
  0x2c   :  { %s1735_s17 = scalar_lea.vmem %s1922_s27, 256  ;;  %p1740_p12 = scmp.lt.s32.totalorder %s1922_s27, %s1922_s27 }
  0x2d   :  { %p1736_p11 = scmp.ne.s32.totalorder %s1922_s27, %s1735_s17  ;;  %p1741_p13 = scmp.lt.s32.totalorder %s1735_s17, %s1735_s17 }
  0x2f   :  { %p1742_p0 = por %p1741_p13, %p1740_p12 }
  0x31   :  { %p1743_p1 = pnand %p1742_p0, %p1736_p11 }
  0x33   :  { %1746 = shalt.err (!%p1743_p1)
}
  0x34   :  { %37 = dma.hbm_to_vmem [thread:$0]  %s2238_s30, 256, %s1922_s27, [#allocation7], %s1823_s22, %s1823_s22, %s1824_s23  }
  0x35   :  { %s1825_s24 = smov [#allocation11]   ;;  %s1826_s28 = smov [#allocation12]  }
  0x36   :  { %s55_s26 = sshll.u32 %s1825_s24, 4  ;;  %s83_s29 = sshll.u32 %s1826_s28, 4  ;;  %s56_s26 = int_to_ptr.vmem [resolvable:$true] %s55_s26  ;;  %s1959_s29 = int_to_ptr.vmem [resolvable:$true] %s83_s29 }
  0x37   :  { %s1747_s19 = scalar_lea.hbm %s2214_s2, 256 }
  0x38   :  { %p1748_p2 = scmp.ne.s32.totalorder %s2214_s2, %s1747_s19  ;;  %p1751_p3 = scmp.lt.u32.totalorder %s1747_s19, %s2214_s2 }
  0x3a   :  { %p1753_p4 = pnand %p1751_p3, %p1748_p2 }
  0x3c   :  { %1756 = shalt.err (!%p1753_p4)
}
  0x3d   :  { %s1757_s27 = scalar_lea.vmem %s56_s26, 256  ;;  %p1762_p6 = scmp.lt.s32.totalorder %s56_s26, %s56_s26 }
  0x3e   :  { %p1758_p5 = scmp.ne.s32.totalorder %s56_s26, %s1757_s27  ;;  %p1763_p7 = scmp.lt.s32.totalorder %s1757_s27, %s1757_s27 }
  0x40   :  { %p1764_p8 = por %p1763_p7, %p1762_p6 }
  0x42   :  { %p1765_p9 = pnand %p1764_p8, %p1758_p5 }
  0x44   :  { %1768 = shalt.err (!%p1765_p9)
}
  0x45   :  { %61 = dma.hbm_to_vmem [thread:$0]  %s2214_s2, 256, %s56_s26, [#allocation10], %s1823_s22, %s1823_s22, %s1824_s23  }
  0x46   :  { %s1769_s16 = scalar_lea.hbm %s2223_s11, 512 }
  0x47   :  { %p1770_p10 = scmp.ne.s32.totalorder %s2223_s11, %s1769_s16  ;;  %p1773_p11 = scmp.lt.u32.totalorder %s1769_s16, %s2223_s11 }
  0x49   :  { %p1775_p12 = pnand %p1773_p11, %p1770_p10 }
  0x4b   :  { %1778 = shalt.err (!%p1775_p12)
}
  0x4c   :  { %s1779_s1 = scalar_lea.vmem %s1959_s29, 512  ;;  %p1784_p0 = scmp.lt.s32.totalorder %s1959_s29, %s1959_s29 }
  0x4d   :  { %p1780_p13 = scmp.ne.s32.totalorder %s1959_s29, %s1779_s1  ;;  %p1785_p1 = scmp.lt.s32.totalorder %s1779_s1, %s1779_s1 }
  0x4f   :  { %p1786_p2 = por %p1785_p1, %p1784_p0 }
  0x51   :  { %p1787_p3 = pnand %p1786_p2, %p1780_p13 }
  0x53   :  { %1790 = shalt.err (!%p1787_p3)
}
  0x54   :  { %89 = dma.hbm_to_vmem [thread:$0]  %s2223_s11, 512, %s1959_s29, [#allocation13], %s1823_s22, %s1823_s22, %s1824_s23  }
  0x55   :  { %1813 = dma.done.wait [#allocation7], 256  }
  0x56   :  { %1814 = vsyncadd [#allocation7], 4294967040 }
  0x57   :  { %1815 = dma.done.wait [#allocation10], 512  }
  0x58   :  { %1816 = vsyncadd [#allocation10], 4294966784 }
  0x59   :  { %1817 = dma.done.wait [#allocation13], 512  }
  0x5a   :  { %1818 = vsyncadd [#allocation13], 4294966784  ;;  %vm129_vm0 = vcmask 261120   ;;  %v118_v0 = vld [vmem:[%s2215_s3] sm:$0xff]  ;;  %v119_v1 = vld [vmem:[%s2215_s3 + $0x8] sm:$0xff]  ;;  %v1827_v18 = vmov 0.0   ;;  %v327_v41 = vlaneseq }
  0x5b   :  { %v120_v2 = vld [vmem:[%s2215_s3 + $0x10] sm:$0xff]  ;;  %v1620_v3 = vpack.c.bf16 %v119_v1, %v118_v0  ;;  %v121_v4 = vld [vmem:[%s2215_s3 + $0x18] sm:$0xff]  ;;  %v2008_v5 = vld [vmem:[#allocation6] sm:$0xff]  ;;  %1539 = vmatprep.subr.mxu1 %v1827_v18  ;;  %vm1828_vm1 = vmmov 0   ;;  %vm339_vm2 = vcmask 130048   ;;  %vm496_vm4 = vcmask 64512  }
  0x5c   :  { %v1624_v6 = vpack.c.bf16 %v121_v4, %v120_v2  ;;  %1522 = vmatprep.mubr.msk.f32.mxu0 %vm129_vm0, %v2008_v5  ;;  %v2012_v7 = vld [vmem:[#allocation6 + $0x8] sm:$0xff]  ;;  %v114_v8 = vld [vmem:[#allocation9] sm:$0xff]  ;;  %v115_v9 = vld [vmem:[#allocation9 + $0x8] sm:$0xff]  ;;  %1541 = vmatprep.mubr.msk.f32.mxu1 %vm1828_vm1, %v1827_v18  ;;  %v2071_v42 = vshrl.u32 %v327_v41, 7  ;;  %v330_v43 = vand.u32 127, %v327_v41  ;;  %s1830_s3 = smov 16  }
  0x5d   :  { %1621 = vmatprep.subr.bf16.mxu0 %v1620_v3  ;;  %v227_v10 = vld [vmem:[%s2217_s5] sm:$0xff]  ;;  %v228_v11 = vld [vmem:[%s2217_s5 + $0x8] sm:$0xff]  ;;  %v229_v13 = vld [vmem:[%s2217_s5 + $0x10] sm:$0xff]  ;;  %vm1025_vm6 = vcmask 261248   ;;  %vm1280_vm7 = vcmask 523264   ;;  %s1831_s16 = smov [#allocation14]  }
  0x5e   :  { %1623 = vmatpush3.bf16.msra.mxu0 %v1620_v3  ;;  %v1628_v12 = vpack.c.bf16 %v228_v11, %v227_v10  ;;  %v230_v14 = vld [vmem:[%s2217_s5 + $0x18] sm:$0xff]  ;;  %v116_v16 = vld [vmem:[#allocation11] sm:$0xff]  ;;  %v117_v17 = vld [vmem:[#allocation11 + $0x8] sm:$0xff]  ;;  %vm331_vm3 = vcmp.lt.s32.totalorder %v330_v43, %v2071_v42  ;;  %vm332_vm5 = vcmp.eq.s32.totalorder %v2071_v42, 0  ;;  %s1415_s28 = sshll.u32 %s1831_s16, 4  ;;  %s1416_s28 = int_to_ptr.vmem [resolvable:$true] %s1415_s28 }
  0x5f   :  { %1625 = vmatprep.subr.bf16.mxu0 %v1624_v6  ;;  %v1632_v15 = vpack.c.bf16 %v230_v14, %v229_v13  ;;  %v1429_v19 = vld [vmem:[%s2216_s4] ss:$0 sm:$0xff]  ;;  %s1829_s4 = smov 112   ;;  %v1031_v41 = vld [vmem:[%s2219_s7 + $0x8] sm:$0xff]  ;;  %v1032_v43 = vld [vmem:[%s2219_s7 + $0x10] sm:$0xff]  ;;  %s1791_s18 = scalar_lea.vmem %s1416_s28, 256 }
  0x60   :  { %v1434_v34 = vld [vmem:[%s2218_s6] ss:$0 sm:$0xff]  ;;  %p1792_p4 = scmp.ne.s32.totalorder %s1416_s28, %s1791_s18  ;;  %p1796_p5 = scmp.lt.s32.totalorder %s1416_s28, %s1416_s28 }
  0x61   :  { %p1797_p6 = scmp.lt.s32.totalorder %s1791_s18, %s1791_s18 }
  0x62   :  { %1627 = vmatpush3.bf16.msra.mxu0 %v1624_v6 }
  0x63   :  { %1629 = vmatprep.subr.bf16.mxu0 %v1628_v12  ;;  %p1798_p7 = por %p1797_p6, %p1796_p5 }
  0x65   :  { %1523 = vmatmul.mubr.msk.f32.vlgmr.msra.gmra.mrb[0].mxu0 %vm129_vm0, %v2012_v7  ;;  %p1799_p8 = pnand %p1798_p7, %p1792_p4 }
  0x66   :  { %1525 = vmatprep.mubr.msk.f32.mxu0 %vm129_vm0, %v114_v8  ;;  %1631 = vmatpush3.bf16.msra.mxu0 %v1628_v12 }
  0x67   :  { %1633 = vmatprep.subr.bf16.mxu0 %v1632_v15 }
  0x69   :  { %1526 = vmatmul.mubr.msk.f32.gmra.mrb[2].mxu0 %vm129_vm0, %v115_v9 }
  0x6a   :  { %1635 = vmatpush3.bf16.msra.mxu0 %v1632_v15  ;;  %1536 = vmatprep.mubr.msk.f32.mxu0 %vm129_vm0, %v116_v16 }
  0x6b   :  { %1544 = vmatprep.subr.mxu0 %v1827_v18 }
  0x6d   :  { %1537 = vmatmul.mubr.msk.f32.vlgmr.msra.gmra.mrb[4].mxu0 %vm129_vm0, %v117_v17 }
  0x6e   :  { %1546 = vmatprep.mubr.msk.f32.mxu0 %vm1828_vm1, %v1827_v18 }
 0x138   :  { %v1524_v20 = vpop.f32.mrb[0].mxu0 }
 0x139   :  { %v214_v21 = vadd.f32 %v1524_v20, %v1429_v19  ;;  %v208_v22 = vpop.f32.mrb[1].mxu0 }
 0x13a   :  { %v209_v23 = vadd.f32 %v1429_v19, %v208_v22 }
 0x13b   :  { %v320_v24 = vmul.f32 0.25, %v214_v21 }
 0x13c   :  { %v319_v25 = vmul.f32 0.25, %v209_v23  ;;  %v1527_v26 = vpop.f32.mrb[2].mxu0 }
 0x13d   :  { %322 = vst.msk [vmem:[#allocation2 + $0x8] sm:$0xff] %vm129_vm0, %v320_v24  ;;  %v224_v27 = vadd.f32 %v1527_v26, %v1429_v19  ;;  %v218_v28 = vpop.f32.mrb[3].mxu0 }
 0x13e   :  { %321 = vst.msk [vmem:[#allocation2] sm:$0xff] %vm129_vm0, %v319_v25  ;;  %v219_v29 = vadd.f32 %v1429_v19, %v218_v28 }
 0x13f   :  { %324 = vst.msk [vmem:[#allocation3 + $0x8] sm:$0xff] %vm129_vm0, %v224_v27 }
 0x140   :  { %323 = vst.msk [vmem:[#allocation3] sm:$0xff] %vm129_vm0, %v219_v29  ;;  %v1538_v35 = vpop.f32.mrb[4].mxu0 }
 0x141   :  { %v316_v36 = vadd.f32 %v1538_v35, %v1434_v34  ;;  %v310_v37 = vpop.f32.mrb[5].mxu0 }
 0x142   :  { %v311_v38 = vadd.f32 %v1434_v34, %v310_v37 }
 0x143   :  { %326 = vst.msk [vmem:[#allocation4 + $0x8] sm:$0xff] %vm129_vm0, %v316_v36 }
 0x144   :  { %v334_v32 = vld [vmem:[#allocation2 + $0x8] sm:$0xff]  ;;  %325 = vst.msk [vmem:[#allocation4] sm:$0xff] %vm129_vm0, %v311_v38 }
 0x145   :  { %v333_v33 = vld [vmem:[#allocation2] sm:$0xff] }
 0x146   :  { %v336_v30 = vld [vmem:[#allocation3 + $0x8] sm:$0xff] }
 0x147   :  { %1545 = vmatpush3.xpose.msk.msra.mxu0 %vm339_vm2, %v336_v30  ;;  %v673_v31 = vld [vmem:[#allocation3] sm:$0xff] }
 0x148   :  { %681 = vrot.lane.b32.xlu1 %v673_v31, %s1829_s4  ;;  %1540 = vmatpush3.xpose.msk.msra.mxu1 %vm339_vm2, %v673_v31 }
 0x149   :  { %1549 = vmatprep.subr.mxu1 %v1827_v18  ;;  %1554 = vmatprep.subr.mxu0 %v1827_v18 }
 0x14a   :  { %1547 = vmatmul.mubr.msk.f32.vlgmr.msra.gmra.mrb[6].mxu0 %vm339_vm2, %v334_v32  ;;  %v2065_v40 = vld [vmem:[#allocation4 + $0x8] sm:$0xff] }
 0x14b   :  { %1542 = vmatmul.mubr.msk.f32.vlgmr.msra.gmra.mrb[0].mxu1 %vm339_vm2, %v333_v33  ;;  %1556 = vmatprep.mubr.msk.f32.mxu0 %vm1828_vm1, %v1827_v18  ;;  %v2063_v39 = vld [vmem:[#allocation4] sm:$0xff] }
 0x14c   :  { %761 = vrot.lane.b32.xlu1 %v336_v30, %s1829_s4  ;;  %1551 = vmatprep.mubr.msk.f32.mxu1 %vm1828_vm1, %v1827_v18 }
 0x14d   :  { %1550 = vmatpush3.msra.mxu1 %v2063_v39  ;;  %1555 = vmatpush3.msra.mxu0 %v2065_v40 }
 0x14e   :  { %1559 = vmatprep.subr.mxu1 %v1827_v18  ;;  %1564 = vmatprep.subr.mxu0 %v1827_v18 }
 0x150   :  { %758 = vrot.lane.b32.xlu1 %v334_v32, %s1829_s4 }
 0x1ba   :  { %v682_v58 = vpop.permute.xlu1 %681 }
 0x1be   :  { %v762_v61 = vpop.permute.xlu1 %761 }
 0x1c2   :  { %v759_v1 = vpop.permute.xlu1 %758 }
 0x21d   :  { %v488_v44 = vpop.f32.mrb[6].mxu0 }
 0x21e   :  { %v412_v45 = vpop.f32.mrb[0].mxu1  ;;  %v1548_v46 = vpop.f32.mrb[7].mxu0  ;;  %v495_v50 = vsel %vm331_vm3, %v488_v44, -1e+32  ;;  %v1033_v44 = vld [vmem:[%s2219_s7 + $0x18] sm:$0xff] }
 0x21f   :  { %v494_v47 = vsel %vm331_vm3, %v412_v45, -1e+32  ;;  %v1543_v48 = vpop.f32.mrb[1].mxu1  ;;  %v500_v51 = vsel %vm496_vm4, %v495_v50, -inf  ;;  %v1640_v45 = vpack.c.bf16 %v1033_v44, %v1032_v43  ;;  %v1271_v44 = vld [vmem:[%s2225_s13 + $0x30] sm:$0xff] }
 0x220   :  { %v497_v49 = vsel %vm496_vm4, %v494_v47, -inf }
 0x221   :  { %498 = vmax.xlane.f32.xlu0 %v497_v49 }
 0x225   :  { %501 = vmax.xlane.f32.xlu0 %v500_v51 }
 0x23b   :  { %678 = vrot.lane.b32.xlu0 %v333_v33, %s1829_s4 }
 0x2ae   :  { %v499_v52 = vpop.xlane.xlu0 %498 }
 0x2af   :  { %v503_v53 = vsub.f32 %v494_v47, %v499_v52 }
 0x2b1   :  { %v505_v54 = vmul.f32 1.442695, %v503_v53 }
 0x2b2   :  { %v502_v55 = vpop.xlane.xlu0 %501 }
 0x2b3   :  { %1679 = vpow2.f32 %v505_v54  ;;  %v504_v56 = vsub.f32 %v495_v50, %v502_v55 }
 0x2b5   :  { %v507_v57 = vmul.f32 1.442695, %v504_v56 }
 0x2b6   :  { %v679_v63 = vpop.permute.xlu0 %678 }
 0x2b7   :  { %1681 = vpow2.f32 %v507_v57 }
 0x2bd   :  { %v1680_v59 = vpop.eup %1679 }
 0x2be   :  { %v517_v60 = vsel %vm332_vm5, 0.0, %v1680_v59  ;;  %v509_v30 = vsel %vm496_vm4, %v1680_v59, 0.0  ;;  %v1451_v59 = vld [vmem:[%s2220_s8] ss:$0 sm:$0xff]  ;;  %s2239_s8 = sld [smem:[#allocation21_spill]] }
 0x2bf   :  { %1552 = vmatmul.mubr.msk.f32.vlgmr.msra.gmra.mrb[2].mxu1 %vm496_vm4, %v517_v60 }
 0x2c0   :  { %1560 = vmatpush3.xpose.msk.msra.mxu1 %vm339_vm2, %v682_v58  ;;  %1561 = vmatprep.mubr.msk.f32.mxu1 %vm1828_vm1, %v1827_v18 }
 0x2c1   :  { %v1682_v62 = vpop.eup %1681  ;;  %1569 = vmatprep.subr.mxu1 %v1827_v18 }
 0x2c2   :  { %v518_v0 = vsel %vm332_vm5, 0.0, %v1682_v62  ;;  %v512_v31 = vsel %vm496_vm4, %v1682_v62, 0.0 }
 0x2c3   :  { %1557 = vmatmul.mubr.msk.f32.vlgmr.msra.gmra.mrb[8].mxu0 %vm496_vm4, %v518_v0  ;;  %1562 = vmatmul.mubr.msk.f32.vlgmr.msra.gmra.mrb[4].mxu1 %vm339_vm2, %v679_v63 }
 0x2c4   :  { %1565 = vmatpush3.xpose.msk.msra.mxu0 %vm339_vm2, %v762_v61  ;;  %1566 = vmatprep.mubr.msk.f32.mxu0 %vm1828_vm1, %v1827_v18 }
 0x2c5   :  { %1574 = vmatprep.subr.mxu0 %v1827_v18  ;;  %1571 = vmatprep.mubr.msk.f32.mxu1 %vm1828_vm1, %v1827_v18 }
 0x2c7   :  { %1567 = vmatmul.mubr.msk.f32.vlgmr.msra.gmra.mrb[10].mxu0 %vm339_vm2, %v759_v1 }
 0x2c8   :  { %1576 = vmatprep.mubr.msk.f32.mxu0 %vm1828_vm1, %v1827_v18 }
 0x392   :  { %v588_v2 = vpop.f32.mrb[2].mxu1 }
 0x393   :  { %v1553_v3 = vpop.f32.mrb[3].mxu1 }
 0x396   :  { %v661_v4 = vpop.f32.mrb[8].mxu0  ;;  %v753_v6 = vpop.f32.mrb[4].mxu1 }
 0x397   :  { %v837_v8 = vsel %vm331_vm3, %v753_v6, -1e+32  ;;  %v1558_v9 = vpop.f32.mrb[9].mxu0  ;;  %v1563_v10 = vpop.f32.mrb[5].mxu1 }
 0x398   :  { %v839_v11 = vsel %vm496_vm4, %v837_v8, -inf }
 0x399   :  { %840 = vmax.xlane.f32.xlu1 %v839_v11 }
 0x39a   :  { %v833_v12 = vpop.f32.mrb[10].mxu0 }
 0x39b   :  { %v838_v13 = vsel %vm331_vm3, %v833_v12, -1e+32  ;;  %v1568_v14 = vpop.f32.mrb[11].mxu0 }
 0x39c   :  { %v842_v15 = vsel %vm496_vm4, %v838_v13, -inf  ;;  %v1172_v14 = vld [vmem:[#allocation12 + $0x8] sm:$0xff] }
 0x39d   :  { %843 = vmax.xlane.f32.xlu0 %v842_v15 }
 0x3aa   :  { %860 = vrot.lane.b32.xlu1 %v2063_v39, %s1829_s4 }
 0x3b3   :  { %937 = vrot.lane.b32.xlu0 %v2065_v40, %s1829_s4  ;;  %v1030_v40 = vld [vmem:[%s2219_s7] sm:$0xff] }
 0x3b4   :  { %v1636_v42 = vpack.c.bf16 %v1031_v41, %v1030_v40 }
 0x426   :  { %v841_v16 = vpop.xlane.xlu1 %840 }
 0x427   :  { %v845_v17 = vsub.f32 %v837_v8, %v841_v16  ;;  %v1173_v16 = vld [vmem:[#allocation12 + $0x10] sm:$0xff] }
 0x429   :  { %v847_v18 = vmul.f32 1.442695, %v845_v17  ;;  %v1174_v17 = vld [vmem:[#allocation12 + $0x18] sm:$0xff] }
 0x42a   :  { %v844_v19 = vpop.xlane.xlu0 %843  ;;  %v861_v20 = vpop.permute.xlu1 %860 }
 0x42b   :  { %1683 = vpow2.f32 %v847_v18  ;;  %v846_v21 = vsub.f32 %v838_v13, %v844_v19  ;;  %1570 = vmatpush3.msra.mxu1 %v861_v20  ;;  %v1171_v13 = vld [vmem:[#allocation12] sm:$0xff]  ;;  %v1648_v18 = vpack.c.bf16 %v1174_v17, %v1173_v16  ;;  %v1265_v19 = vld [vmem:[%s2225_s13] sm:$0xff]  ;;  %v1266_v20 = vld [vmem:[%s2225_s13 + $0x8] sm:$0xff] }
 0x42c   :  { %1637 = vmatprep.subr.bf16.mxu1 %v1636_v42  ;;  %v1644_v15 = vpack.c.bf16 %v1172_v14, %v1171_v13  ;;  %v1460_v16 = vld [vmem:[%s2227_s15] ss:$0 sm:$0xff] }
 0x42d   :  { %v849_v22 = vmul.f32 1.442695, %v846_v21  ;;  %v1267_v21 = vld [vmem:[%s2225_s13 + $0x10] sm:$0xff] }
 0x42e   :  { %v938_v23 = vpop.permute.xlu0 %937 }
 0x42f   :  { %1685 = vpow2.f32 %v849_v22  ;;  %1575 = vmatpush3.msra.mxu0 %v938_v23  ;;  %v1652_v22 = vpack.c.bf16 %v1266_v20, %v1265_v19  ;;  %v1268_v23 = vld [vmem:[%s2225_s13 + $0x18] sm:$0xff]  ;;  %v1461_v20 = vld [vmem:[%s2239_s8] ss:$0 sm:$0xff] }
 0x430   :  { %1645 = vmatprep.subr.bf16.mxu0 %v1644_v15 }
 0x435   :  { %v1684_v24 = vpop.eup %1683 }
 0x436   :  { %v851_v25 = vsel %vm496_vm4, %v1684_v24, 0.0  ;;  %v857_v26 = vsel %vm332_vm5, 0.0, %v1684_v24  ;;  %v1656_v24 = vpack.c.bf16 %v1268_v23, %v1267_v21 }
 0x437   :  { %852 = vadd.xlane.f32.xlu1 %v851_v25  ;;  %1572 = vmatmul.mubr.msk.f32.vlgmr.msra.gmra.mrb[6].mxu1 %vm496_vm4, %v857_v26  ;;  %v1269_v25 = vld [vmem:[%s2225_s13 + $0x20] sm:$0xff]  ;;  %v1270_v26 = vld [vmem:[%s2225_s13 + $0x28] sm:$0xff] }
 0x438   :  { %1639 = vmatpush3.bf16.msra.mxu1 %v1636_v42 }
 0x439   :  { %v1686_v27 = vpop.eup %1685  ;;  %1641 = vmatprep.subr.bf16.mxu1 %v1640_v45 }
 0x43a   :  { %v854_v28 = vsel %vm496_vm4, %v1686_v27, 0.0  ;;  %v858_v29 = vsel %vm332_vm5, 0.0, %v1686_v27  ;;  %v1660_v27 = vpack.c.bf16 %v1270_v26, %v1269_v25 }
 0x43b   :  { %855 = vadd.xlane.f32.xlu0 %v854_v28  ;;  %1577 = vmatmul.mubr.msk.f32.vlgmr.msra.gmra.mrb[12].mxu0 %vm496_vm4, %v858_v29 }
 0x43c   :  { %510 = vadd.xlane.f32.xlu1 %v509_v30  ;;  %1643 = vmatpush3.bf16.msra.mxu1 %v1640_v45  ;;  %v1272_v45 = vld [vmem:[%s2225_s13 + $0x38] sm:$0xff] }
 0x43d   :  { %1647 = vmatpush3.bf16.msra.mxu0 %v1644_v15  ;;  %1653 = vmatprep.subr.bf16.mxu1 %v1652_v22 }
 0x43e   :  { %1649 = vmatprep.subr.bf16.mxu0 %v1648_v18 }
 0x440   :  { %513 = vadd.xlane.f32.xlu1 %v512_v31 }
 0x441   :  { %1651 = vmatpush3.bf16.msra.mxu0 %v1648_v18 }
 0x4c4   :  { %v853_v32 = vpop.xlane.xlu1 %852 }
 0x4c8   :  { %v856_v39 = vpop.xlane.xlu0 %855 }
 0x4c9   :  { %v511_v33 = vpop.xlane.xlu1 %510 }
 0x4ca   :  { %1687 = vrcp.f32 %v511_v33 }
 0x4cd   :  { %v514_v34 = vpop.xlane.xlu1 %513 }
 0x4ce   :  { %1689 = vrcp.f32 %v514_v34 }
 0x4cf   :  { %1691 = vrcp.f32 %v853_v32 }
 0x4d0   :  { %1693 = vrcp.f32 %v856_v39 }
 0x4d4   :  { %v1688_v35 = vpop.eup %1687 }
 0x4d5   :  { %v666_v36 = vmul.f32 %v1688_v35, %v588_v2  ;;  %v1452_v35 = vld [vmem:[%s2221_s9] ss:$0 sm:$0xff] }
 0x4d7   :  { %669 = vst.msk [vmem:[#allocation5] sm:$0xff] %vm339_vm2, %v666_v36 }
 0x4d8   :  { %v1690_v37 = vpop.eup %1689 }
 0x4d9   :  { %v668_v38 = vmul.f32 %v1690_v37, %v661_v4  ;;  %v1692_v46 = vpop.eup %1691  ;;  %v1453_v37 = vld [vmem:[%s2222_s10] ss:$0 sm:$0xff] }
 0x4da   :  { %v1694_v50 = vpop.eup %1693 }
 0x4db   :  { %670 = vst.msk [vmem:[#allocation5 + $0x8] sm:$0xff] %vm339_vm2, %v668_v38 }
 0x50a   :  { %v932_v47 = vpop.f32.mrb[6].mxu1 }
 0x50b   :  { %v1014_v48 = vmul.f32 %v1692_v46, %v932_v47  ;;  %v1573_v49 = vpop.f32.mrb[7].mxu1  ;;  %v1664_v46 = vpack.c.bf16 %v1272_v45, %v1271_v44  ;;  %v1454_v47 = vld [vmem:[%s2224_s12] ss:$0 sm:$0xff] }
 0x50d   :  { %1019 = vrot.lane.b32.xlu1 %v1014_v48, %s1830_s3 }
 0x50e   :  { %v1009_v51 = vpop.f32.mrb[12].mxu0 }
 0x50f   :  { %v1016_v52 = vmul.f32 %v1694_v50, %v1009_v51  ;;  %v1578_v53 = vpop.f32.mrb[13].mxu0 }
 0x511   :  { %1021 = vrot.lane.b32.xlu0 %v1016_v52, %s1830_s3 }
 0x57f   :  { %v1020_v54 = vpop.permute.xlu1 %1019 }
 0x580   :  { %1026 = vst.msk [vmem:[#allocation5] sm:$0xff] %vm1025_vm6, %v1020_v54  ;;  %v1457_v54 = vld [vmem:[%s2226_s14] ss:$0 sm:$0xff] }
 0x583   :  { %v1022_v55 = vpop.permute.xlu0 %1021 }
 0x584   :  { %1027 = vst.msk [vmem:[#allocation5 + $0x8] sm:$0xff] %vm1025_vm6, %v1022_v55 }
 0x587   :  { %v1028_v56 = vld [vmem:[#allocation5] sm:$0xff] }
 0x588   :  { %1587 = vmatprep.mubr.msk.f32.mxu1 %vm129_vm0, %v1028_v56 }
 0x58b   :  { %v1029_v57 = vld [vmem:[#allocation5 + $0x8] sm:$0xff] }
 0x58c   :  { %1588 = vmatmul.mubr.msk.f32.vlgmr.msra.gmra.mrb[8].mxu1 %vm129_vm0, %v1029_v57 }
 0x58d   :  { %1655 = vmatpush3.bf16.msra.mxu1 %v1652_v22 }
 0x58e   :  { %1657 = vmatprep.subr.bf16.mxu1 %v1656_v24 }
 0x591   :  { %1659 = vmatpush3.bf16.msra.mxu1 %v1656_v24 }
 0x592   :  { %1661 = vmatprep.subr.bf16.mxu1 %v1660_v27 }
 0x595   :  { %1663 = vmatpush3.bf16.msra.mxu1 %v1660_v27 }
 0x596   :  { %1665 = vmatprep.subr.bf16.mxu1 %v1664_v46 }
 0x599   :  { %1667 = vmatpush3.bf16.msra.mxu1 %v1664_v46 }
 0x65f   :  { %v1589_v58 = vpop.f32.mrb[8].mxu1 }
 0x660   :  { %v1116_v60 = vadd.f32 %v1589_v58, %v2012_v7  ;;  %v1106_v61 = vpop.f32.mrb[9].mxu1 }
 0x661   :  { %v1115_v62 = vadd.f32 %v1106_v61, %v2008_v5 }
 0x662   :  { %v1125_v63 = vadd.f32 %v1451_v59, %v1116_v60 }
 0x663   :  { %v1124_v0 = vadd.f32 %v1451_v59, %v1115_v62 }
 0x664   :  { %v1131_v1 = vsel %vm129_vm0, %v1125_v63, 0.0 }
 0x665   :  { %1132 = vadd.xlane.f32.xlu0 %v1131_v1  ;;  %v1128_v2 = vsel %vm129_vm0, %v1124_v0, 0.0 }
 0x666   :  { %1129 = vadd.xlane.f32.xlu1 %v1128_v2 }
 0x6f2   :  { %v1133_v3 = vpop.xlane.xlu0 %1132 }
 0x6f3   :  { %v1136_v4 = vmul.f32 0.03125, %v1133_v3  ;;  %v1130_v6 = vpop.xlane.xlu1 %1129 }
 0x6f4   :  { %v1135_v8 = vmul.f32 0.03125, %v1130_v6 }
 0x6f5   :  { %v1138_v9 = vsub.f32 %v1125_v63, %v1136_v4 }
 0x6f6   :  { %v1137_v10 = vsub.f32 %v1124_v0, %v1135_v8 }
 0x6f7   :  { %v1140_v12 = vmul.f32 %v1138_v9, %v1138_v9 }
 0x6f8   :  { %v1139_v11 = vmul.f32 %v1137_v10, %v1137_v10 }
 0x6f9   :  { %v1144_v5 = vsel %vm129_vm0, %v1140_v12, 0.0 }
 0x6fa   :  { %v1141_v7 = vsel %vm129_vm0, %v1139_v11, 0.0 }
 0x6fb   :  { %1142 = vadd.xlane.f32.xlu1 %v1141_v7 }
 0x6ff   :  { %1145 = vadd.xlane.f32.xlu1 %v1144_v5 }
 0x788   :  { %v1143_v28 = vpop.xlane.xlu1 %1142 }
 0x789   :  { %v1147_v29 = vmul.f32 0.03125, %v1143_v28 }
 0x78b   :  { %v1149_v30 = vadd.f32 1e-05, %v1147_v29 }
 0x78c   :  { %v1146_v31 = vpop.xlane.xlu1 %1145 }
 0x78d   :  { %1695 = vrsqrt.f32 %v1149_v30  ;;  %v1148_v32 = vmul.f32 0.03125, %v1146_v31 }
 0x78f   :  { %v1150_v33 = vadd.f32 1e-05, %v1148_v32 }
 0x791   :  { %1697 = vrsqrt.f32 %v1150_v33 }
 0x797   :  { %v1696_v34 = vpop.eup %1695 }
 0x798   :  { %v1153_v36 = vmul.f32 %v1696_v34, %v1137_v10 }
 0x79a   :  { %v1161_v38 = vmul.f32 %v1452_v35, %v1153_v36 }
 0x79b   :  { %v1698_v39 = vpop.eup %1697 }
 0x79c   :  { %v1154_v40 = vmul.f32 %v1698_v39, %v1138_v9  ;;  %v1169_v41 = vadd.f32 %v1453_v37, %v1161_v38 }
 0x79e   :  { %v1162_v42 = vmul.f32 %v1452_v35, %v1154_v40  ;;  %1598 = vmatprep.mubr.msk.f32.mxu0 %vm129_vm0, %v1169_v41 }
 0x7a0   :  { %v1170_v43 = vadd.f32 %v1453_v37, %v1162_v42 }
 0x7a2   :  { %1599 = vmatmul.mubr.msk.f32.vlgmr.msra.gmra.mrb[14].mxu0 %vm129_vm0, %v1170_v43 }
 0x875   :  { %v1600_v48 = vpop.f32.mrb[14].mxu0 }
 0x876   :  { %v1260_v49 = vadd.f32 %v1600_v48, %v1454_v47  ;;  %v1254_v50 = vpop.f32.mrb[15].mxu0 }
 0x877   :  { %v1255_v51 = vadd.f32 %v1454_v47, %v1254_v50 }
 0x878   :  { %v1264_v53 = vmax.f32 %v1260_v49, 0.0 }
 0x879   :  { %v1263_v52 = vmax.f32 %v1255_v51, 0.0 }
 0x87b   :  { %1617 = vmatprep.mubr.msk.f32.mxu1 %vm1280_vm7, %v1263_v52 }
 0x87c   :  { %1618 = vmatmul.mubr.msk.f32.vlgmr.msra.gmra.mrb[10].mxu1 %vm1280_vm7, %v1264_v53 }
 0x94f   :  { %v1619_v55 = vpop.f32.mrb[10].mxu1 }
 0x950   :  { %v1359_v56 = vadd.f32 %v1619_v55, %v1457_v54  ;;  %v1353_v57 = vpop.f32.mrb[11].mxu1 }
 0x951   :  { %v1354_v58 = vadd.f32 %v1457_v54, %v1353_v57 }
 0x952   :  { %v1363_v59 = vadd.f32 %v1359_v56, %v1170_v43 }
 0x953   :  { %v1362_v60 = vadd.f32 %v1354_v58, %v1169_v41 }
 0x954   :  { %v1369_v61 = vsel %vm129_vm0, %v1363_v59, 0.0 }
 0x955   :  { %1370 = vadd.xlane.f32.xlu1 %v1369_v61  ;;  %v1366_v62 = vsel %vm129_vm0, %v1362_v60, 0.0 }
 0x956   :  { %1367 = vadd.xlane.f32.xlu0 %v1366_v62 }
 0x9e2   :  { %v1371_v63 = vpop.xlane.xlu1 %1370 }
 0x9e3   :  { %v1373_v0 = vmul.f32 0.03125, %v1371_v63  ;;  %v1368_v1 = vpop.xlane.xlu0 %1367 }
 0x9e4   :  { %v1372_v2 = vmul.f32 0.03125, %v1368_v1 }
 0x9e5   :  { %v1375_v3 = vsub.f32 %v1363_v59, %v1373_v0 }
 0x9e6   :  { %v1374_v4 = vsub.f32 %v1362_v60, %v1372_v2 }
 0x9e7   :  { %v1377_v6 = vmul.f32 %v1375_v3, %v1375_v3 }
 0x9e8   :  { %v1376_v8 = vmul.f32 %v1374_v4, %v1374_v4 }
 0x9e9   :  { %v1381_v9 = vsel %vm129_vm0, %v1377_v6, 0.0 }
 0x9ea   :  { %1382 = vadd.xlane.f32.xlu1 %v1381_v9  ;;  %v1378_v10 = vsel %vm129_vm0, %v1376_v8, 0.0 }
 0x9eb   :  { %1379 = vadd.xlane.f32.xlu0 %v1378_v10 }
 0xa77   :  { %v1383_v11 = vpop.xlane.xlu1 %1382 }
 0xa78   :  { %v1385_v7 = vmul.f32 0.03125, %v1383_v11  ;;  %v1380_v12 = vpop.xlane.xlu0 %1379 }
 0xa79   :  { %v1384_v5 = vmul.f32 0.03125, %v1380_v12 }
 0xa7a   :  { %v1387_v13 = vadd.f32 1e-05, %v1385_v7 }
 0xa7b   :  { %v1386_v14 = vadd.f32 1e-05, %v1384_v5 }
 0xa7c   :  { %1699 = vrsqrt.f32 %v1387_v13 }
 0xa7d   :  { %1701 = vrsqrt.f32 %v1386_v14 }
 0xa86   :  { %v1700_v15 = vpop.eup %1699 }
 0xa87   :  { %v1702_v17 = vpop.eup %1701  ;;  %v1391_v18 = vmul.f32 %v1700_v15, %v1375_v3 }
 0xa88   :  { %v1390_v19 = vmul.f32 %v1702_v17, %v1374_v4 }
 0xa89   :  { %v1399_v21 = vmul.f32 %v1460_v16, %v1391_v18 }
 0xa8a   :  { %v1398_v22 = vmul.f32 %v1460_v16, %v1390_v19 }
 0xa8b   :  { %v1407_v23 = vadd.f32 %v1461_v20, %v1399_v21 }
 0xa8c   :  { %v1406_v24 = vadd.f32 %v1461_v20, %v1398_v22 }
 0xa8d   :  { %1409 = vst.msk [vmem:[#allocation14 + $0x8] sm:$0xff] %vm129_vm0, %v1407_v23 }
 0xa8e   :  { %1408 = vst.msk [vmem:[#allocation14] sm:$0xff] %vm129_vm0, %v1406_v24 }
 0xa8f   :  { %1802 = shalt.err (!%p1799_p8)
}
 0xa90   :  { %s2240_s19 = sld [smem:[#allocation22_spill]] }
 0xa96   :  { %s1803_s1 = scalar_lea.hbm %s2240_s19, 256 }
 0xa97   :  { %p1804_p9 = scmp.ne.s32.totalorder %s2240_s19, %s1803_s1  ;;  %p1807_p10 = scmp.lt.u32.totalorder %s1803_s1, %s2240_s19 }
 0xa99   :  { %p1809_p11 = pnand %p1807_p10, %p1804_p9 }
 0xa9b   :  { %1812 = shalt.err (!%p1809_p11)
}
 0xa9c   :  { %1421 = dma.vmem_to_hbm [thread:$0]  %s1416_s28, 256, %s2240_s19, [#allocation8], %s1823_s22, %s1823_s22, %s1824_s23  }
 0xa9d   :  { %1819 = dma.done.wait [#allocation8], 256  }
 0xa9e   :  { %1820 = vsyncadd [#allocation8], 4294967040 }
 0xa9f   :  { %1425 = vsyncpa [#allocation7], 1 }
 0xaa0   :  { %1426 = vsyncpa [#allocation10], 1 }
 0xaa1   :  { %1427 = vsyncpa [#allocation13], 1 }
 0xaa2   :  { %1428 = vsyncpa [#allocation8], 1 }

// kernel: tpu_custom_call.1
= control target key start
LH: loop header
LB: loop body
LE: loop exit
PB: predicated region body
PF: predicated region fallthrough
CT: control target
= control target key end

     0   :  { %s2212_s0 = inlined_call_operand.hbm [shape: f32[2,8,32], index: 0, kind: input, shape index: {}]   ;;  %s2213_s1 = inlined_call_operand.hbm [shape: f32[2,8,32], index: 1, kind: input, shape index: {}]   ;;  %s2214_s2 = inlined_call_operand.hbm [shape: f32[2,8,32], index: 2, kind: input, shape index: {}]   ;;  %s2215_s3 = inlined_call_operand.vmem [shape: f32[32,32], index: 3, kind: input, shape index: {}]   ;;  %s2216_s4 = inlined_call_operand.vmem [shape: f32[1,32], index: 4, kind: input, shape index: {}]   ;;  %s2217_s5 = inlined_call_operand.vmem [shape: f32[32,32], index: 5, kind: input, shape index: {}]   ;;  %s2218_s6 = inlined_call_operand.vmem [shape: f32[1,32], index: 6, kind: input, shape index: {}]   ;;  %s2219_s7 = inlined_call_operand.vmem [shape: f32[32,32], index: 7, kind: input, shape index: {}]   ;;  %s2220_s8 = inlined_call_operand.vmem [shape: f32[1,32], index: 8, kind: input, shape index: {}]   ;;  %s2221_s9 = inlined_call_operand.vmem [shape: f32[1,32], index: 9, kind: input, shape index: {}]   ;;  %s2222_s10 = inlined_call_operand.vmem [shape: f32[1,32], index: 10, kind: input, shape index: {}]   ;;  %s2223_s11 = inlined_call_operand.hbm [shape: f32[32,64], index: 11, kind: input, shape index: {}]   ;;  %s2224_s12 = inlined_call_operand.vmem [shape: f32[1,64], index: 12, kind: input, shape index: {}]   ;;  %s2225_s13 = inlined_call_operand.vmem [shape: f32[64,32], index: 13, kind: input, shape index: {}]   ;;  %s2226_s14 = inlined_call_operand.vmem [shape: f32[1,32], index: 14, kind: input, shape index: {}]   ;;  %s2227_s15 = inlined_call_operand.vmem [shape: f32[1,32], index: 15, kind: input, shape index: {}]   ;;  %s2228_s16 = inlined_call_operand.vmem [shape: f32[1,32], index: 16, kind: input, shape index: {}]   ;;  %s2229_s17 = inlined_call_operand.hbm [shape: f32[2,8,32], index: 17, kind: output, shape index: {}]  }
   0x1   :  { %2233 = sst [smem:[#allocation19_spill]] %s2212_s0 }
   0x2   :  { %2234 = sst [smem:[#allocation20_spill]] %s2213_s1 }
   0x3   :  { %2235 = sst [smem:[#allocation21_spill]] %s2228_s16 }
   0x4   :  { %2236 = sst [smem:[#allocation22_spill]] %s2229_s17 }
   0x5   :  { %22 = vsyncpa [#allocation7], 0 }
   0x6   :  { %23 = vsyncpa [#allocation10], 0 }
   0x7   :  { %24 = vsyncpa [#allocation13], 0 }
   0x8   :  { %25 = vsyncpa [#allocation8], 0  ;;  %s1821_s24 = smov [#allocation9]   ;;  %s1822_s26 = smov [#allocation6]  }
   0x9   :  { %s43_s25 = sshll.u32 %s1821_s24, 4  ;;  %s31_s27 = sshll.u32 %s1822_s26, 4  ;;  %s44_s25 = int_to_ptr.vmem [resolvable:$true] %s43_s25  ;;  %s1922_s27 = int_to_ptr.vmem [resolvable:$true] %s31_s27 }
   0xa   :  { %s2237_s0 = sld [smem:[#allocation20_spill]] }
  0x10   :  { %s1703_s30 = scalar_lea.hbm %s2237_s0, 256 }
  0x11   :  { %p1704_p0 = scmp.ne.s32.totalorder %s2237_s0, %s1703_s30  ;;  %p1707_p1 = scmp.lt.u32.totalorder %s1703_s30, %s2237_s0 }
  0x13   :  { %p1709_p2 = pnand %p1707_p1, %p1704_p0 }
  0x15   :  { %1712 = shalt.err (!%p1709_p2)
}
  0x16   :  { %s1713_s21 = scalar_lea.vmem %s44_s25, 256  ;;  %p1718_p4 = scmp.lt.s32.totalorder %s44_s25, %s44_s25 }
  0x17   :  { %p1714_p3 = scmp.ne.s32.totalorder %s44_s25, %s1713_s21  ;;  %p1719_p5 = scmp.lt.s32.totalorder %s1713_s21, %s1713_s21 }
  0x19   :  { %p1720_p6 = por %p1719_p5, %p1718_p4 }
  0x1b   :  { %p1721_p7 = pnand %p1720_p6, %p1714_p3 }
  0x1d   :  { %1724 = shalt.err (!%p1721_p7)
}
  0x1e   :  { %s1823_s22 = smov 128   ;;  %s1824_s23 = smov 8  }
  0x1f   :  { %49 = dma.hbm_to_vmem [thread:$0]  %s2237_s0, 256, %s44_s25, [#allocation10], %s1823_s22, %s1823_s22, %s1824_s23  }
  0x20   :  { %s2238_s30 = sld [smem:[#allocation19_spill]] }
  0x26   :  { %s1725_s18 = scalar_lea.hbm %s2238_s30, 256 }
  0x27   :  { %p1726_p8 = scmp.ne.s32.totalorder %s2238_s30, %s1725_s18  ;;  %p1729_p9 = scmp.lt.u32.totalorder %s1725_s18, %s2238_s30 }
  0x29   :  { %p1731_p10 = pnand %p1729_p9, %p1726_p8 }
  0x2b   :  { %1734 = shalt.err (!%p1731_p10)
}
  0x2c   :  { %s1735_s17 = scalar_lea.vmem %s1922_s27, 256  ;;  %p1740_p12 = scmp.lt.s32.totalorder %s1922_s27, %s1922_s27 }
  0x2d   :  { %p1736_p11 = scmp.ne.s32.totalorder %s1922_s27, %s1735_s17  ;;  %p1741_p13 = scmp.lt.s32.totalorder %s1735_s17, %s1735_s17 }
  0x2f   :  { %p1742_p0 = por %p1741_p13, %p1740_p12 }
  0x31   :  { %p1743_p1 = pnand %p1742_p0, %p1736_p11 }
  0x33   :  { %1746 = shalt.err (!%p1743_p1)
}
  0x34   :  { %37 = dma.hbm_to_vmem [thread:$0]  %s2238_s30, 256, %s1922_s27, [#allocation7], %s1823_s22, %s1823_s22, %s1824_s23  }
  0x35   :  { %s1825_s24 = smov [#allocation11]   ;;  %s1826_s28 = smov [#allocation12]  }
  0x36   :  { %s55_s26 = sshll.u32 %s1825_s24, 4  ;;  %s83_s29 = sshll.u32 %s1826_s28, 4  ;;  %s56_s26 = int_to_ptr.vmem [resolvable:$true] %s55_s26  ;;  %s1959_s29 = int_to_ptr.vmem [resolvable:$true] %s83_s29 }
  0x37   :  { %s1747_s19 = scalar_lea.hbm %s2214_s2, 256 }
  0x38   :  { %p1748_p2 = scmp.ne.s32.totalorder %s2214_s2, %s1747_s19  ;;  %p1751_p3 = scmp.lt.u32.totalorder %s1747_s19, %s2214_s2 }
  0x3a   :  { %p1753_p4 = pnand %p1751_p3, %p1748_p2 }
  0x3c   :  { %1756 = shalt.err (!%p1753_p4)
}
  0x3d   :  { %s1757_s27 = scalar_lea.vmem %s56_s26, 256  ;;  %p1762_p6 = scmp.lt.s32.totalorder %s56_s26, %s56_s26 }
  0x3e   :  { %p1758_p5 = scmp.ne.s32.totalorder %s56_s26, %s1757_s27  ;;  %p1763_p7 = scmp.lt.s32.totalorder %s1757_s27, %s1757_s27 }
  0x40   :  { %p1764_p8 = por %p1763_p7, %p1762_p6 }
  0x42   :  { %p1765_p9 = pnand %p1764_p8, %p1758_p5 }
  0x44   :  { %1768 = shalt.err (!%p1765_p9)
}
  0x45   :  { %61 = dma.hbm_to_vmem [thread:$0]  %s2214_s2, 256, %s56_s26, [#allocation10], %s1823_s22, %s1823_s22, %s1824_s23  }
  0x46   :  { %s1769_s16 = scalar_lea.hbm %s2223_s11, 512 }
  0x47   :  { %p1770_p10 = scmp.ne.s32.totalorder %s2223_s11, %s1769_s16  ;;  %p1773_p11 = scmp.lt.u32.totalorder %s1769_s16, %s2223_s11 }
  0x49   :  { %p1775_p12 = pnand %p1773_p11, %p1770_p10 }
  0x4b   :  { %1778 = shalt.err (!%p1775_p12)
}
  0x4c   :  { %s1779_s1 = scalar_lea.vmem %s1959_s29, 512  ;;  %p1784_p0 = scmp.lt.s32.totalorder %s1959_s29, %s1959_s29 }
  0x4d   :  { %p1780_p13 = scmp.ne.s32.totalorder %s1959_s29, %s1779_s1  ;;  %p1785_p1 = scmp.lt.s32.totalorder %s1779_s1, %s1779_s1 }
  0x4f   :  { %p1786_p2 = por %p1785_p1, %p1784_p0 }
  0x51   :  { %p1787_p3 = pnand %p1786_p2, %p1780_p13 }
  0x53   :  { %1790 = shalt.err (!%p1787_p3)
}
  0x54   :  { %89 = dma.hbm_to_vmem [thread:$0]  %s2223_s11, 512, %s1959_s29, [#allocation13], %s1823_s22, %s1823_s22, %s1824_s23  }
  0x55   :  { %1813 = dma.done.wait [#allocation7], 256  }
  0x56   :  { %1814 = vsyncadd [#allocation7], 4294967040 }
  0x57   :  { %1815 = dma.done.wait [#allocation10], 512  }
  0x58   :  { %1816 = vsyncadd [#allocation10], 4294966784 }
  0x59   :  { %1817 = dma.done.wait [#allocation13], 512  }
  0x5a   :  { %1818 = vsyncadd [#allocation13], 4294966784  ;;  %vm129_vm0 = vcmask 261120   ;;  %v118_v0 = vld [vmem:[%s2215_s3] sm:$0xff]  ;;  %v119_v1 = vld [vmem:[%s2215_s3 + $0x8] sm:$0xff]  ;;  %v1827_v18 = vmov 0.0   ;;  %v327_v41 = vlaneseq }
  0x5b   :  { %v120_v2 = vld [vmem:[%s2215_s3 + $0x10] sm:$0xff]  ;;  %v1620_v3 = vpack.c.bf16 %v119_v1, %v118_v0  ;;  %v121_v4 = vld [vmem:[%s2215_s3 + $0x18] sm:$0xff]  ;;  %v2008_v5 = vld [vmem:[#allocation6] sm:$0xff]  ;;  %1539 = vmatprep.subr.mxu1 %v1827_v18  ;;  %vm1828_vm1 = vmmov 0   ;;  %vm339_vm2 = vcmask 130048   ;;  %vm496_vm4 = vcmask 64512  }
  0x5c   :  { %v1624_v6 = vpack.c.bf16 %v121_v4, %v120_v2  ;;  %1522 = vmatprep.mubr.msk.f32.mxu0 %vm129_vm0, %v2008_v5  ;;  %v2012_v7 = vld [vmem:[#allocation6 + $0x8] sm:$0xff]  ;;  %v114_v8 = vld [vmem:[#allocation9] sm:$0xff]  ;;  %v115_v9 = vld [vmem:[#allocation9 + $0x8] sm:$0xff]  ;;  %1541 = vmatprep.mubr.msk.f32.mxu1 %vm1828_vm1, %v1827_v18  ;;  %v2071_v42 = vshrl.u32 %v327_v41, 7  ;;  %v330_v43 = vand.u32 127, %v327_v41  ;;  %s1830_s3 = smov 16  }
  0x5d   :  { %1621 = vmatprep.subr.bf16.mxu0 %v1620_v3  ;;  %v227_v10 = vld [vmem:[%s2217_s5] sm:$0xff]  ;;  %v228_v11 = vld [vmem:[%s2217_s5 + $0x8] sm:$0xff]  ;;  %v229_v13 = vld [vmem:[%s2217_s5 + $0x10] sm:$0xff]  ;;  %vm1025_vm6 = vcmask 261248   ;;  %vm1280_vm7 = vcmask 523264   ;;  %s1831_s16 = smov [#allocation14]  }
  0x5e   :  { %1623 = vmatpush3.bf16.msra.mxu0 %v1620_v3  ;;  %v1628_v12 = vpack.c.bf16 %v228_v11, %v227_v10  ;;  %v230_v14 = vld [vmem:[%s2217_s5 + $0x18] sm:$0xff]  ;;  %v116_v16 = vld [vmem:[#allocation11] sm:$0xff]  ;;  %v117_v17 = vld [vmem:[#allocation11 + $0x8] sm:$0xff]  ;;  %vm331_vm3 = vcmp.lt.s32.totalorder %v330_v43, %v2071_v42  ;;  %vm332_vm5 = vcmp.eq.s32.totalorder %v2071_v42, 0  ;;  %s1415_s28 = sshll.u32 %s1831_s16, 4  ;;  %s1416_s28 = int_to_ptr.vmem [resolvable:$true] %s1415_s28 }
  0x5f   :  { %1625 = vmatprep.subr.bf16.mxu0 %v1624_v6  ;;  %v1632_v15 = vpack.c.bf16 %v230_v14, %v229_v13  ;;  %v1429_v19 = vld [vmem:[%s2216_s4] ss:$0 sm:$0xff]  ;;  %s1829_s4 = smov 112   ;;  %v1031_v41 = vld [vmem:[%s2219_s7 + $0x8] sm:$0xff]  ;;  %v1032_v43 = vld [vmem:[%s2219_s7 + $0x10] sm:$0xff]  ;;  %s1791_s18 = scalar_lea.vmem %s1416_s28, 256 }
  0x60   :  { %v1434_v34 = vld [vmem:[%s2218_s6] ss:$0 sm:$0xff]  ;;  %p1792_p4 = scmp.ne.s32.totalorder %s1416_s28, %s1791_s18  ;;  %p1796_p5 = scmp.lt.s32.totalorder %s1416_s28, %s1416_s28 }
  0x61   :  { %p1797_p6 = scmp.lt.s32.totalorder %s1791_s18, %s1791_s18 }
  0x62   :  { %1627 = vmatpush3.bf16.msra.mxu0 %v1624_v6 }
  0x63   :  { %1629 = vmatprep.subr.bf16.mxu0 %v1628_v12  ;;  %p1798_p7 = por %p1797_p6, %p1796_p5 }
  0x65   :  { %1523 = vmatmul.mubr.msk.f32.vlgmr.msra.gmra.mrb[0].mxu0 %vm129_vm0, %v2012_v7  ;;  %p1799_p8 = pnand %p1798_p7, %p1792_p4 }
  0x66   :  { %1525 = vmatprep.mubr.msk.f32.mxu0 %vm129_vm0, %v114_v8  ;;  %1631 = vmatpush3.bf16.msra.mxu0 %v1628_v12 }
  0x67   :  { %1633 = vmatprep.subr.bf16.mxu0 %v1632_v15 }
  0x69   :  { %1526 = vmatmul.mubr.msk.f32.gmra.mrb[2].mxu0 %vm129_vm0, %v115_v9 }
  0x6a   :  { %1635 = vmatpush3.bf16.msra.mxu0 %v1632_v15  ;;  %1536 = vmatprep.mubr.msk.f32.mxu0 %vm129_vm0, %v116_v16 }
  0x6b   :  { %1544 = vmatprep.subr.mxu0 %v1827_v18 }
  0x6d   :  { %1537 = vmatmul.mubr.msk.f32.vlgmr.msra.gmra.mrb[4].mxu0 %vm129_vm0, %v117_v17 }
  0x6e   :  { %1546 = vmatprep.mubr.msk.f32.mxu0 %vm1828_vm1, %v1827_v18 }
 0x138   :  { %v1524_v20 = vpop.f32.mrb[0].mxu0 }
 0x139   :  { %v214_v21 = vadd.f32 %v1524_v20, %v1429_v19  ;;  %v208_v22 = vpop.f32.mrb[1].mxu0 }
 0x13a   :  { %v209_v23 = vadd.f32 %v1429_v19, %v208_v22 }
 0x13b   :  { %v320_v24 = vmul.f32 0.25, %v214_v21 }
 0x13c   :  { %v319_v25 = vmul.f32 0.25, %v209_v23  ;;  %v1527_v26 = vpop.f32.mrb[2].mxu0 }
 0x13d   :  { %322 = vst.msk [vmem:[#allocation2 + $0x8] sm:$0xff] %vm129_vm0, %v320_v24  ;;  %v224_v27 = vadd.f32 %v1527_v26, %v1429_v19  ;;  %v218_v28 = vpop.f32.mrb[3].mxu0 }
 0x13e   :  { %321 = vst.msk [vmem:[#allocation2] sm:$0xff] %vm129_vm0, %v319_v25  ;;  %v219_v29 = vadd.f32 %v1429_v19, %v218_v28 }
 0x13f   :  { %324 = vst.msk [vmem:[#allocation3 + $0x8] sm:$0xff] %vm129_vm0, %v224_v27 }
 0x140   :  { %323 = vst.msk [vmem:[#allocation3] sm:$0xff] %vm129_vm0, %v219_v29  ;;  %v1538_v35 = vpop.f32.mrb[4].mxu0 }
 0x141   :  { %v316_v36 = vadd.f32 %v1538_v35, %v1434_v34  ;;  %v310_v37 = vpop.f32.mrb[5].mxu0 }
 0x142   :  { %v311_v38 = vadd.f32 %v1434_v34, %v310_v37 }
 0x143   :  { %326 = vst.msk [vmem:[#allocation4 + $0x8] sm:$0xff] %vm129_vm0, %v316_v36 }
 0x144   :  { %v334_v32 = vld [vmem:[#allocation2 + $0x8] sm:$0xff]  ;;  %325 = vst.msk [vmem:[#allocation4] sm:$0xff] %vm129_vm0, %v311_v38 }
 0x145   :  { %v333_v33 = vld [vmem:[#allocation2] sm:$0xff] }
 0x146   :  { %v336_v30 = vld [vmem:[#allocation3 + $0x8] sm:$0xff] }
 0x147   :  { %1545 = vmatpush3.xpose.msk.msra.mxu0 %vm339_vm2, %v336_v30  ;;  %v673_v31 = vld [vmem:[#allocation3] sm:$0xff] }
 0x148   :  { %681 = vrot.lane.b32.xlu1 %v673_v31, %s1829_s4  ;;  %1540 = vmatpush3.xpose.msk.msra.mxu1 %vm339_vm2, %v673_v31 }
 0x149   :  { %1549 = vmatprep.subr.mxu1 %v1827_v18  ;;  %1554 = vmatprep.subr.mxu0 %v1827_v18 }
 0x14a   :  { %1547 = vmatmul.mubr.msk.f32.vlgmr.msra.gmra.mrb[6].mxu0 %vm339_vm2, %v334_v32  ;;  %v2065_v40 = vld [vmem:[#allocation4 + $0x8] sm:$0xff] }
 0x14b   :  { %1542 = vmatmul.mubr.msk.f32.vlgmr.msra.gmra.mrb[0].mxu1 %vm339_vm2, %v333_v33  ;;  %1556 = vmatprep.mubr.msk.f32.mxu0 %vm1828_vm1, %v1827_v18  ;;  %v2063_v39 = vld [vmem:[#allocation4] sm:$0xff] }
 0x14c   :  { %761 = vrot.lane.b32.xlu1 %v336_v30, %s1829_s4  ;;  %1551 = vmatprep.mubr.msk.f32.mxu1 %vm1828_vm1, %v1827_v18 }
 0x14d   :  { %1550 = vmatpush3.msra.mxu1 %v2063_v39  ;;  %1555 = vmatpush3.msra.mxu0 %v2065_v40 }
 0x14e   :  { %1559 = vmatprep.subr.mxu1 %v1827_v18  ;;  %1564 = vmatprep.subr.mxu0 %v1827_v18 }
 0x150   :  { %758 = vrot.lane.b32.xlu1 %v334_v32, %s1829_s4 }
 0x1ba   :  { %v682_v58 = vpop.permute.xlu1 %681 }
 0x1be   :  { %v762_v61 = vpop.permute.xlu1 %761 }
 0x1c2   :  { %v759_v1 = vpop.permute.xlu1 %758 }
 0x21d   :  { %v488_v44 = vpop.f32.mrb[6].mxu0 }
 0x21e   :  { %v412_v45 = vpop.f32.mrb[0].mxu1  ;;  %v1548_v46 = vpop.f32.mrb[7].mxu0  ;;  %v495_v50 = vsel %vm331_vm3, %v488_v44, -1e+32  ;;  %v1033_v44 = vld [vmem:[%s2219_s7 + $0x18] sm:$0xff] }
 0x21f   :  { %v494_v47 = vsel %vm331_vm3, %v412_v45, -1e+32  ;;  %v1543_v48 = vpop.f32.mrb[1].mxu1  ;;  %v500_v51 = vsel %vm496_vm4, %v495_v50, -inf  ;;  %v1640_v45 = vpack.c.bf16 %v1033_v44, %v1032_v43  ;;  %v1271_v44 = vld [vmem:[%s2225_s13 + $0x30] sm:$0xff] }
 0x220   :  { %v497_v49 = vsel %vm496_vm4, %v494_v47, -inf }
 0x221   :  { %498 = vmax.xlane.f32.xlu0 %v497_v49 }
 0x225   :  { %501 = vmax.xlane.f32.xlu0 %v500_v51 }
 0x23b   :  { %678 = vrot.lane.b32.xlu0 %v333_v33, %s1829_s4 }
 0x2ae   :  { %v499_v52 = vpop.xlane.xlu0 %498 }
 0x2af   :  { %v503_v53 = vsub.f32 %v494_v47, %v499_v52 }
 0x2b1   :  { %v505_v54 = vmul.f32 1.442695, %v503_v53 }
 0x2b2   :  { %v502_v55 = vpop.xlane.xlu0 %501 }
 0x2b3   :  { %1679 = vpow2.f32 %v505_v54  ;;  %v504_v56 = vsub.f32 %v495_v50, %v502_v55 }
 0x2b5   :  { %v507_v57 = vmul.f32 1.442695, %v504_v56 }
 0x2b6   :  { %v679_v63 = vpop.permute.xlu0 %678 }
 0x2b7   :  { %1681 = vpow2.f32 %v507_v57 }
 0x2bd   :  { %v1680_v59 = vpop.eup %1679 }
 0x2be   :  { %v517_v60 = vsel %vm332_vm5, 0.0, %v1680_v59  ;;  %v509_v30 = vsel %vm496_vm4, %v1680_v59, 0.0  ;;  %v1451_v59 = vld [vmem:[%s2220_s8] ss:$0 sm:$0xff]  ;;  %s2239_s8 = sld [smem:[#allocation21_spill]] }
 0x2bf   :  { %1552 = vmatmul.mubr.msk.f32.vlgmr.msra.gmra.mrb[2].mxu1 %vm496_vm4, %v517_v60 }
 0x2c0   :  { %1560 = vmatpush3.xpose.msk.msra.mxu1 %vm339_vm2, %v682_v58  ;;  %1561 = vmatprep.mubr.msk.f32.mxu1 %vm1828_vm1, %v1827_v18 }
 0x2c1   :  { %v1682_v62 = vpop.eup %1681  ;;  %1569 = vmatprep.subr.mxu1 %v1827_v18 }
 0x2c2   :  { %v518_v0 = vsel %vm332_vm5, 0.0, %v1682_v62  ;;  %v512_v31 = vsel %vm496_vm4, %v1682_v62, 0.0 }
 0x2c3   :  { %1557 = vmatmul.mubr.msk.f32.vlgmr.msra.gmra.mrb[8].mxu0 %vm496_vm4, %v518_v0  ;;  %1562 = vmatmul.mubr.msk.f32.vlgmr.msra.gmra.mrb[4].mxu1 %vm339_vm2, %v679_v63 }
 0x2c4   :  { %1565 = vmatpush3.xpose.msk.msra.mxu0 %vm339_vm2, %v762_v61  ;;  %1566 = vmatprep.mubr.msk.f32.mxu0 %vm1828_vm1, %v1827_v18 }
 0x2c5   :  { %1574 = vmatprep.subr.mxu0 %v1827_v18  ;;  %1571 = vmatprep.mubr.msk.f32.mxu1 %vm1828_vm1, %v1827_v18 }
 0x2c7   :  { %1567 = vmatmul.mubr.msk.f32.vlgmr.msra.gmra.mrb[10].mxu0 %vm339_vm2, %v759_v1 }
 0x2c8   :  { %1576 = vmatprep.mubr.msk.f32.mxu0 %vm1828_vm1, %v1827_v18 }
 0x392   :  { %v588_v2 = vpop.f32.mrb[2].mxu1 }
 0x393   :  { %v1553_v3 = vpop.f32.mrb[3].mxu1 }
 0x396   :  { %v661_v4 = vpop.f32.mrb[8].mxu0  ;;  %v753_v6 = vpop.f32.mrb[4].mxu1 }
 0x397   :  { %v837_v8 = vsel %vm331_vm3, %v753_v6, -1e+32  ;;  %v1558_v9 = vpop.f32.mrb[9].mxu0  ;;  %v1563_v10 = vpop.f32.mrb[5].mxu1 }
 0x398   :  { %v839_v11 = vsel %vm496_vm4, %v837_v8, -inf }
 0x399   :  { %840 = vmax.xlane.f32.xlu1 %v839_v11 }
 0x39a   :  { %v833_v12 = vpop.f32.mrb[10].mxu0 }
 0x39b   :  { %v838_v13 = vsel %vm331_vm3, %v833_v12, -1e+32  ;;  %v1568_v14 = vpop.f32.mrb[11].mxu0 }
 0x39c   :  { %v842_v15 = vsel %vm496_vm4, %v838_v13, -inf  ;;  %v1172_v14 = vld [vmem:[#allocation12 + $0x8] sm:$0xff] }
 0x39d   :  { %843 = vmax.xlane.f32.xlu0 %v842_v15 }
 0x3aa   :  { %860 = vrot.lane.b32.xlu1 %v2063_v39, %s1829_s4 }
 0x3b3   :  { %937 = vrot.lane.b32.xlu0 %v2065_v40, %s1829_s4  ;;  %v1030_v40 = vld [vmem:[%s2219_s7] sm:$0xff] }
 0x3b4   :  { %v1636_v42 = vpack.c.bf16 %v1031_v41, %v1030_v40 }
 0x426   :  { %v841_v16 = vpop.xlane.xlu1 %840 }
 0x427   :  { %v845_v17 = vsub.f32 %v837_v8, %v841_v16  ;;  %v1173_v16 = vld [vmem:[#allocation12 + $0x10] sm:$0xff] }
 0x429   :  { %v847_v18 = vmul.f32 1.442695, %v845_v17  ;;  %v1174_v17 = vld [vmem:[#allocation12 + $0x18] sm:$0xff] }
 0x42a   :  { %v844_v19 = vpop.xlane.xlu0 %843  ;;  %v861_v20 = vpop.permute.xlu1 %860 }
 0x42b   :  { %1683 = vpow2.f32 %v847_v18  ;;  %v846_v21 = vsub.f32 %v838_v13, %v844_v19  ;;  %1570 = vmatpush3.msra.mxu1 %v861_v20  ;;  %v1171_v13 = vld [vmem:[#allocation12] sm:$0xff]  ;;  %v1648_v18 = vpack.c.bf16 %v1174_v17, %v1173_v16  ;;  %v1265_v19 = vld [vmem:[%s2225_s13] sm:$0xff]  ;;  %v1266_v20 = vld [vmem:[%s2225_s13 + $0x8] sm:$0xff] }
 0x42c   :  { %1637 = vmatprep.subr.bf16.mxu1 %v1636_v42  ;;  %v1644_v15 = vpack.c.bf16 %v1172_v14, %v1171_v13  ;;  %v1460_v16 = vld [vmem:[%s2227_s15] ss:$0 sm:$0xff] }
 0x42d   :  { %v849_v22 = vmul.f32 1.442695, %v846_v21  ;;  %v1267_v21 = vld [vmem:[%s2225_s13 + $0x10] sm:$0xff] }
 0x42e   :  { %v938_v23 = vpop.permute.xlu0 %937 }
 0x42f   :  { %1685 = vpow2.f32 %v849_v22  ;;  %1575 = vmatpush3.msra.mxu0 %v938_v23  ;;  %v1652_v22 = vpack.c.bf16 %v1266_v20, %v1265_v19  ;;  %v1268_v23 = vld [vmem:[%s2225_s13 + $0x18] sm:$0xff]  ;;  %v1461_v20 = vld [vmem:[%s2239_s8] ss:$0 sm:$0xff] }
 0x430   :  { %1645 = vmatprep.subr.bf16.mxu0 %v1644_v15 }
 0x435   :  { %v1684_v24 = vpop.eup %1683 }
 0x436   :  { %v851_v25 = vsel %vm496_vm4, %v1684_v24, 0.0  ;;  %v857_v26 = vsel %vm332_vm5, 0.0, %v1684_v24  ;;  %v1656_v24 = vpack.c.bf16 %v1268_v23, %v1267_v21 }
 0x437   :  { %852 = vadd.xlane.f32.xlu1 %v851_v25  ;;  %1572 = vmatmul.mubr.msk.f32.vlgmr.msra.gmra.mrb[6].mxu1 %vm496_vm4, %v857_v26  ;;  %v1269_v25 = vld [vmem:[%s2225_s13 + $0x20] sm:$0xff]  ;;  %v1270_v26 = vld [vmem:[%s2225_s13 + $0x28] sm:$0xff] }
 0x438   :  { %1639 = vmatpush3.bf16.msra.mxu1 %v1636_v42 }
 0x439   :  { %v1686_v27 = vpop.eup %1685  ;;  %1641 = vmatprep.subr.bf16.mxu1 %v1640_v45 }
 0x43a   :  { %v854_v28 = vsel %vm496_vm4, %v1686_v27, 0.0  ;;  %v858_v29 = vsel %vm332_vm5, 0.0, %v1686_v27  ;;  %v1660_v27 = vpack.c.bf16 %v1270_v26, %v1269_v25 }
 0x43b   :  { %855 = vadd.xlane.f32.xlu0 %v854_v28  ;;  %1577 = vmatmul.mubr.msk.f32.vlgmr.msra.gmra.mrb[12].mxu0 %vm496_vm4, %v858_v29 }
 0x43c   :  { %510 = vadd.xlane.f32.xlu1 %v509_v30  ;;  %1643 = vmatpush3.bf16.msra.mxu1 %v1640_v45  ;;  %v1272_v45 = vld [vmem:[%s2225_s13 + $0x38] sm:$0xff] }
 0x43d   :  { %1647 = vmatpush3.bf16.msra.mxu0 %v1644_v15  ;;  %1653 = vmatprep.subr.bf16.mxu1 %v1652_v22 }
 0x43e   :  { %1649 = vmatprep.subr.bf16.mxu0 %v1648_v18 }
 0x440   :  { %513 = vadd.xlane.f32.xlu1 %v512_v31 }
 0x441   :  { %1651 = vmatpush3.bf16.msra.mxu0 %v1648_v18 }
 0x4c4   :  { %v853_v32 = vpop.xlane.xlu1 %852 }
 0x4c8   :  { %v856_v39 = vpop.xlane.xlu0 %855 }
 0x4c9   :  { %v511_v33 = vpop.xlane.xlu1 %510 }
 0x4ca   :  { %1687 = vrcp.f32 %v511_v33 }
 0x4cd   :  { %v514_v34 = vpop.xlane.xlu1 %513 }
 0x4ce   :  { %1689 = vrcp.f32 %v514_v34 }
 0x4cf   :  { %1691 = vrcp.f32 %v853_v32 }
 0x4d0   :  { %1693 = vrcp.f32 %v856_v39 }
 0x4d4   :  { %v1688_v35 = vpop.eup %1687 }
 0x4d5   :  { %v666_v36 = vmul.f32 %v1688_v35, %v588_v2  ;;  %v1452_v35 = vld [vmem:[%s2221_s9] ss:$0 sm:$0xff] }
 0x4d7   :  { %669 = vst.msk [vmem:[#allocation5] sm:$0xff] %vm339_vm2, %v666_v36 }
 0x4d8   :  { %v1690_v37 = vpop.eup %1689 }
 0x4d9   :  { %v668_v38 = vmul.f32 %v1690_v37, %v661_v4  ;;  %v1692_v46 = vpop.eup %1691  ;;  %v1453_v37 = vld [vmem:[%s2222_s10] ss:$0 sm:$0xff] }
 0x4da   :  { %v1694_v50 = vpop.eup %1693 }
 0x4db   :  { %670 = vst.msk [vmem:[#allocation5 + $0x8] sm:$0xff] %vm339_vm2, %v668_v38 }
 0x50a   :  { %v932_v47 = vpop.f32.mrb[6].mxu1 }
 0x50b   :  { %v1014_v48 = vmul.f32 %v1692_v46, %v932_v47  ;;  %v1573_v49 = vpop.f32.mrb[7].mxu1  ;;  %v1664_v46 = vpack.c.bf16 %v1272_v45, %v1271_v44  ;;  %v1454_v47 = vld [vmem:[%s2224_s12] ss:$0 sm:$0xff] }
 0x50d   :  { %1019 = vrot.lane.b32.xlu1 %v1014_v48, %s1830_s3 }
 0x50e   :  { %v1009_v51 = vpop.f32.mrb[12].mxu0 }
 0x50f   :  { %v1016_v52 = vmul.f32 %v1694_v50, %v1009_v51  ;;  %v1578_v53 = vpop.f32.mrb[13].mxu0 }
 0x511   :  { %1021 = vrot.lane.b32.xlu0 %v1016_v52, %s1830_s3 }
 0x57f   :  { %v1020_v54 = vpop.permute.xlu1 %1019 }
 0x580   :  { %1026 = vst.msk [vmem:[#allocation5] sm:$0xff] %vm1025_vm6, %v1020_v54  ;;  %v1457_v54 = vld [vmem:[%s2226_s14] ss:$0 sm:$0xff] }
 0x583   :  { %v1022_v55 = vpop.permute.xlu0 %1021 }
 0x584   :  { %1027 = vst.msk [vmem:[#allocation5 + $0x8] sm:$0xff] %vm1025_vm6, %v1022_v55 }
 0x587   :  { %v1028_v56 = vld [vmem:[#allocation5] sm:$0xff] }
 0x588   :  { %1587 = vmatprep.mubr.msk.f32.mxu1 %vm129_vm0, %v1028_v56 }
 0x58b   :  { %v1029_v57 = vld [vmem:[#allocation5 + $0x8] sm:$0xff] }
 0x58c   :  { %1588 = vmatmul.mubr.msk.f32.vlgmr.msra.gmra.mrb[8].mxu1 %vm129_vm0, %v1029_v57 }
 0x58d   :  { %1655 = vmatpush3.bf16.msra.mxu1 %v1652_v22 }
 0x58e   :  { %1657 = vmatprep.subr.bf16.mxu1 %v1656_v24 }
 0x591   :  { %1659 = vmatpush3.bf16.msra.mxu1 %v1656_v24 }
 0x592   :  { %1661 = vmatprep.subr.bf16.mxu1 %v1660_v27 }
 0x595   :  { %1663 = vmatpush3.bf16.msra.mxu1 %v1660_v27 }
 0x596   :  { %1665 = vmatprep.subr.bf16.mxu1 %v1664_v46 }
 0x599   :  { %1667 = vmatpush3.bf16.msra.mxu1 %v1664_v46 }
 0x65f   :  { %v1589_v58 = vpop.f32.mrb[8].mxu1 }
 0x660   :  { %v1116_v60 = vadd.f32 %v1589_v58, %v2012_v7  ;;  %v1106_v61 = vpop.f32.mrb[9].mxu1 }
 0x661   :  { %v1115_v62 = vadd.f32 %v1106_v61, %v2008_v5 }
 0x662   :  { %v1125_v63 = vadd.f32 %v1451_v59, %v1116_v60 }
 0x663   :  { %v1124_v0 = vadd.f32 %v1451_v59, %v1115_v62 }
 0x664   :  { %v1131_v1 = vsel %vm129_vm0, %v1125_v63, 0.0 }
 0x665   :  { %1132 = vadd.xlane.f32.xlu0 %v1131_v1  ;;  %v1128_v2 = vsel %vm129_vm0, %v1124_v0, 0.0 }
 0x666   :  { %1129 = vadd.xlane.f32.xlu1 %v1128_v2 }
 0x6f2   :  { %v1133_v3 = vpop.xlane.xlu0 %1132 }
 0x6f3   :  { %v1136_v4 = vmul.f32 0.03125, %v1133_v3  ;;  %v1130_v6 = vpop.xlane.xlu1 %1129 }
 0x6f4   :  { %v1135_v8 = vmul.f32 0.03125, %v1130_v6 }
 0x6f5   :  { %v1138_v9 = vsub.f32 %v1125_v63, %v1136_v4 }
 0x6f6   :  { %v1137_v10 = vsub.f32 %v1124_v0, %v1135_v8 }
 0x6f7   :  { %v1140_v12 = vmul.f32 %v1138_v9, %v1138_v9 }
 0x6f8   :  { %v1139_v11 = vmul.f32 %v1137_v10, %v1137_v10 }
 0x6f9   :  { %v1144_v5 = vsel %vm129_vm0, %v1140_v12, 0.0 }
 0x6fa   :  { %v1141_v7 = vsel %vm129_vm0, %v1139_v11, 0.0 }
 0x6fb   :  { %1142 = vadd.xlane.f32.xlu1 %v1141_v7 }
 0x6ff   :  { %1145 = vadd.xlane.f32.xlu1 %v1144_v5 }
 0x788   :  { %v1143_v28 = vpop.xlane.xlu1 %1142 }
 0x789   :  { %v1147_v29 = vmul.f32 0.03125, %v1143_v28 }
 0x78b   :  { %v1149_v30 = vadd.f32 1e-05, %v1147_v29 }
 0x78c   :  { %v1146_v31 = vpop.xlane.xlu1 %1145 }
 0x78d   :  { %1695 = vrsqrt.f32 %v1149_v30  ;;  %v1148_v32 = vmul.f32 0.03125, %v1146_v31 }
 0x78f   :  { %v1150_v33 = vadd.f32 1e-05, %v1148_v32 }
 0x791   :  { %1697 = vrsqrt.f32 %v1150_v33 }
 0x797   :  { %v1696_v34 = vpop.eup %1695 }
 0x798   :  { %v1153_v36 = vmul.f32 %v1696_v34, %v1137_v10 }
 0x79a   :  { %v1161_v38 = vmul.f32 %v1452_v35, %v1153_v36 }
 0x79b   :  { %v1698_v39 = vpop.eup %1697 }
 0x79c   :  { %v1154_v40 = vmul.f32 %v1698_v39, %v1138_v9  ;;  %v1169_v41 = vadd.f32 %v1453_v37, %v1161_v38 }
 0x79e   :  { %v1162_v42 = vmul.f32 %v1452_v35, %v1154_v40  ;;  %1598 = vmatprep.mubr.msk.f32.mxu0 %vm129_vm0, %v1169_v41 }
 0x7a0   :  { %v1170_v43 = vadd.f32 %v1453_v37, %v1162_v42 }
 0x7a2   :  { %1599 = vmatmul.mubr.msk.f32.vlgmr.msra.gmra.mrb[14].mxu0 %vm129_vm0, %v1170_v43 }
 0x875   :  { %v1600_v48 = vpop.f32.mrb[14].mxu0 }
 0x876   :  { %v1260_v49 = vadd.f32 %v1600_v48, %v1454_v47  ;;  %v1254_v50 = vpop.f32.mrb[15].mxu0 }
 0x877   :  { %v1255_v51 = vadd.f32 %v1454_v47, %v1254_v50 }
 0x878   :  { %v1264_v53 = vmax.f32 %v1260_v49, 0.0 }
 0x879   :  { %v1263_v52 = vmax.f32 %v1255_v51, 0.0 }
 0x87b   :  { %1617 = vmatprep.mubr.msk.f32.mxu1 %vm1280_vm7, %v1263_v52 }
 0x87c   :  { %1618 = vmatmul.mubr.msk.f32.vlgmr.msra.gmra.mrb[10].mxu1 %vm1280_vm7, %v1264_v53 }
 0x94f   :  { %v1619_v55 = vpop.f32.mrb[10].mxu1 }
 0x950   :  { %v1359_v56 = vadd.f32 %v1619_v55, %v1457_v54  ;;  %v1353_v57 = vpop.f32.mrb[11].mxu1 }
 0x951   :  { %v1354_v58 = vadd.f32 %v1457_v54, %v1353_v57 }
 0x952   :  { %v1363_v59 = vadd.f32 %v1359_v56, %v1170_v43 }
 0x953   :  { %v1362_v60 = vadd.f32 %v1354_v58, %v1169_v41 }
 0x954   :  { %v1369_v61 = vsel %vm129_vm0, %v1363_v59, 0.0 }
 0x955   :  { %1370 = vadd.xlane.f32.xlu1 %v1369_v61  ;;  %v1366_v62 = vsel %vm129_vm0, %v1362_v60, 0.0 }
 0x956   :  { %1367 = vadd.xlane.f32.xlu0 %v1366_v62 }
 0x9e2   :  { %v1371_v63 = vpop.xlane.xlu1 %1370 }
 0x9e3   :  { %v1373_v0 = vmul.f32 0.03125, %v1371_v63  ;;  %v1368_v1 = vpop.xlane.xlu0 %1367 }
 0x9e4   :  { %v1372_v2 = vmul.f32 0.03125, %v1368_v1 }
 0x9e5   :  { %v1375_v3 = vsub.f32 %v1363_v59, %v1373_v0 }
 0x9e6   :  { %v1374_v4 = vsub.f32 %v1362_v60, %v1372_v2 }
 0x9e7   :  { %v1377_v6 = vmul.f32 %v1375_v3, %v1375_v3 }
 0x9e8   :  { %v1376_v8 = vmul.f32 %v1374_v4, %v1374_v4 }
 0x9e9   :  { %v1381_v9 = vsel %vm129_vm0, %v1377_v6, 0.0 }
 0x9ea   :  { %1382 = vadd.xlane.f32.xlu1 %v1381_v9  ;;  %v1378_v10 = vsel %vm129_vm0, %v1376_v8, 0.0 }
 0x9eb   :  { %1379 = vadd.xlane.f32.xlu0 %v1378_v10 }
 0xa77   :  { %v1383_v11 = vpop.xlane.xlu1 %1382 }
 0xa78   :  { %v1385_v7 = vmul.f32 0.03125, %v1383_v11  ;;  %v1380_v12 = vpop.xlane.xlu0 %1379 }
 0xa79   :  { %v1384_v5 = vmul.f32 0.03125, %v1380_v12 }
 0xa7a   :  { %v1387_v13 = vadd.f32 1e-05, %v1385_v7 }
 0xa7b   :  { %v1386_v14 = vadd.f32 1e-05, %v1384_v5 }
 0xa7c   :  { %1699 = vrsqrt.f32 %v1387_v13 }
 0xa7d   :  { %1701 = vrsqrt.f32 %v1386_v14 }
 0xa86   :  { %v1700_v15 = vpop.eup %1699 }
 0xa87   :  { %v1702_v17 = vpop.eup %1701  ;;  %v1391_v18 = vmul.f32 %v1700_v15, %v1375_v3 }
 0xa88   :  { %v1390_v19 = vmul.f32 %v1702_v17, %v1374_v4 }
 0xa89   :  { %v1399_v21 = vmul.f32 %v1460_v16, %v1391_v18 }
 0xa8a   :  { %v1398_v22 = vmul.f32 %v1460_v16, %v1390_v19 }
 0xa8b   :  { %v1407_v23 = vadd.f32 %v1461_v20, %v1399_v21 }
 0xa8c   :  { %v1406_v24 = vadd.f32 %v1461_v20, %v1398_v22 }
 0xa8d   :  { %1409 = vst.msk [vmem:[#allocation14 + $0x8] sm:$0xff] %vm129_vm0, %v1407_v23 }
 0xa8e   :  { %1408 = vst.msk [vmem:[#allocation14] sm:$0xff] %vm129_vm0, %v1406_v24 }
 0xa8f   :  { %1802 = shalt.err (!%p1799_p8)
}
 0xa90   :  { %s2240_s19 = sld [smem:[#allocation22_spill]] }
 0xa96   :  { %s1803_s1 = scalar_lea.hbm %s2240_s19, 256 }
 0xa97   :  { %p1804_p9 = scmp.ne.s32.totalorder %s2240_s19, %s1803_s1  ;;  %p1807_p10 = scmp.lt.u32.totalorder %s1803_s1, %s2240_s19 }
 0xa99   :  { %p1809_p11 = pnand %p1807_p10, %p1804_p9 }
 0xa9b   :  { %1812 = shalt.err (!%p1809_p11)
}
 0xa9c   :  { %1421 = dma.vmem_to_hbm [thread:$0]  %s1416_s28, 256, %s2240_s19, [#allocation8], %s1823_s22, %s1823_s22, %s1824_s23  }
 0xa9d   :  { %1819 = dma.done.wait [#allocation8], 256  }
 0xa9e   :  { %1820 = vsyncadd [#allocation8], 4294967040 }
 0xa9f   :  { %1425 = vsyncpa [#allocation7], 1 }
 0xaa0   :  { %1426 = vsyncpa [#allocation10], 1 }
 0xaa1   :  { %1427 = vsyncpa [#allocation13], 1 }
 0xaa2   :  { %1428 = vsyncpa [#allocation8], 1 }

</bundles_post_ra>
